<compile_context>
chip_gen: v6e
topology: v6e:2x2x1
jax: 0.10.0
libtpu: 0.0.40
codegen_flags: <defaults>
</compile_context>

<pallas_src>
import functools

import jax
import jax.numpy as jnp
from jax.experimental import pallas as pl
from jax.experimental.pallas import tpu as pltpu

K = 3             # kSize
EPS = 1e-5        # InstanceNorm3d eps
NEG_SLOPE = 0.01  # LeakyReLU negative_slope


def _round_up(x, m):
    return (x + m - 1) // m * m


def _cna3d_kernel(x_ref, w_ref, mask_ref, o_ref, col_ref, *,
                  D, H, W, Hp, Wp, Cin, L):
    """One grid step = one sample of the batch.

    x_ref    : (1, Cin, Wx)        bf16, flat padded input (lane-dense)
    w_ref    : (Cout, K^3*Cin)     bf16, pre-reshaped weight (resident)
    mask_ref : (1, L)              f32, 1.0 at valid output positions
    o_ref    : (1, Cout, L)        f32, lane-dense output slab
    col_ref  : (K^3*Cin, L)        f32 VMEM scratch (im2col slab)
    """
    # ---- build the im2col slab with static lane-axis shifts only ----
    t = 0
    for kd in range(K):
        for kh in range(K):
            for kw in range(K):
                off = kd * Hp * Wp + kh * Wp + kw            # static int
                col_ref[t * Cin:(t + 1) * Cin, :] = (
                    x_ref[0, :, off:off + L].astype(jnp.float32))
                t += 1

    # ---- single fused matmul: contraction = K^3*Cin, N = L (lane-dense) ----
    acc = jnp.dot(w_ref[...].astype(jnp.float32), col_ref[...],
                  preferred_element_type=jnp.float32)         # (Cout, L)

    # ---- InstanceNorm3d (affine=False, biased var): single-pass masked stats
    #      over the S = D*H*W valid lanes ----
    mask = mask_ref[...]                                      # (1, L)
    inv_s = 1.0 / float(D * H * W)
    s1 = jnp.sum(acc * mask, axis=-1, keepdims=True)          # (Cout, 1)
    s2 = jnp.sum(acc * acc * mask, axis=-1, keepdims=True)    # (Cout, 1)
    mean = s1 * inv_s
    var = jnp.maximum(s2 * inv_s - mean * mean, 0.0)
    y = (acc - mean) * jax.lax.rsqrt(var + EPS)

    # ---- LeakyReLU ----
    y = jnp.where(y >= 0, y, NEG_SLOPE * y)

    o_ref[...] = y[None].astype(o_ref.dtype)


def cna3d_forward(x_ncdhw, weight_oikkk, bias_o=None):
    """x: (N, Cin, D, H, W); weight: (Cout, Cin, K, K, K); bias: (Cout,) or None.

    The conv bias is intentionally NOT applied: InstanceNorm3d(affine=False)
    subtracts the per-channel mean immediately afterwards, which cancels any
    per-channel constant exactly.
    """
    del bias_o  # cancelled by the instance norm (affine=False)

    N, Cin, D, H, W = x_ncdhw.shape
    Cout = weight_oikkk.shape[0]
    pad = K // 2
    Dp, Hp, Wp = D + 2 * pad, H + 2 * pad, W + 2 * pad
    P = Dp * Hp * Wp                         # flat padded spatial size
    L = _round_up(P, 128)                    # lane-dense slab width
    max_off = (K - 1) * Hp * Wp + (K - 1) * Wp + (K - 1)
    Wx = _round_up(L + max_off, 128)         # input width: shifts never read OOB
    K3Cin = K * K * K * Cin

    # ---- wrapper-side layout plumbing (channels-first, flat, lane-dense) ----
    x_pad = jnp.pad(x_ncdhw, ((0, 0), (0, 0), (pad, pad), (pad, pad), (pad, pad)))
    x_flat = x_pad.reshape(N, Cin, P)
    x_flat = jnp.pad(x_flat, ((0, 0), (0, 0), (0, Wx - P))).astype(jnp.bfloat16)

    # weight -> (Cout, K^3*Cin); column order = ((kd*K + kh)*K + kw)*Cin + ci
    w2 = jnp.transpose(weight_oikkk, (0, 2, 3, 4, 1)).reshape(Cout, K3Cin)
    w2 = w2.astype(jnp.bfloat16)

    # validity mask over flat padded coordinate p = d*Hp*Wp + h*Wp + w
    p = jnp.arange(L)
    d = p // (Hp * Wp)
    r = p % (Hp * Wp)
    h = r // Wp
    w = r % Wp
    mask = ((d < D) & (h < H) & (w < W)).astype(jnp.float32).reshape(1, L)

    kernel = functools.partial(_cna3d_kernel, D=D, H=H, W=W, Hp=Hp, Wp=Wp,
                               Cin=Cin, L=L)

    out_flat = pl.pallas_call(
        kernel,
        out_shape=jax.ShapeDtypeStruct((N, Cout, L), jnp.float32),
        grid_spec=pltpu.PrefetchScalarGridSpec(
            num_scalar_prefetch=0,
            grid=(N,),
            in_specs=[
                pl.BlockSpec((1, Cin, Wx), lambda n: (n, 0, 0)),
                pl.BlockSpec((Cout, K3Cin), lambda n: (0, 0)),   # resident
                pl.BlockSpec((1, L), lambda n: (0, 0)),          # resident
            ],
            out_specs=pl.BlockSpec((1, Cout, L), lambda n: (n, 0, 0)),
            scratch_shapes=[pltpu.VMEM((K3Cin, L), jnp.float32)],
        ),
        compiler_params=pltpu.CompilerParams(
            dimension_semantics=("parallel",),
            vmem_limit_bytes=32 * 1024 * 1024,
        ),
    )(x_flat, w2, mask)

    # TODO(synk): for large volumes (v7x's 64 MiB VMEM), tile over D with a
    # 1-plane halo and accumulate cross-tile instance-norm statistics in
    # scratch (two-pass or sum/sumsq carry) instead of one sample per step;
    # also batch several small samples per grid step to amortize the ~0.35us
    # per-step overhead.

    # back to PyTorch NCDHW layout (pure slicing/reshape in the wrapper)
    out = out_flat[:, :, :P].reshape(N, Cout, Dp, Hp, Wp)[:, :, :D, :H, :W]
    return out


def _reference(x_ncdhw, weight, bias):
    """Pure-JAX reference: conv3d (same padding) + instance norm + leaky relu."""
    y = jax.lax.conv_general_dilated(
        x_ncdhw, weight,
        window_strides=(1, 1, 1),
        padding=((1, 1), (1, 1), (1, 1)),
        dimension_numbers=("NCDHW", "OIDHW", "NCDHW"),
    ) + bias[None, :, None, None, None]
    mean = jnp.mean(y, axis=(2, 3, 4), keepdims=True)
    var = jnp.mean((y - mean) ** 2, axis=(2, 3, 4), keepdims=True)
    y = (y - mean) * jax.lax.rsqrt(var + EPS)
    return jnp.where(y >= 0, y, NEG_SLOPE * y)


if __name__ == "__main__":
    # Small, deterministic setup.
    N, Cin, Cout = 2, 4, 8
    D = H = W = 8

    key = jax.random.PRNGKey(0)
    kx, kw, kb = jax.random.split(key, 3)

    x = jax.random.normal(kx, (N, Cin, D, H, W), dtype=jnp.float32)
    # Deterministic "Conv3d" parameters (synthetic init, kaiming-uniform-ish scale).
    fan_in = Cin * K * K * K
    bound = 1.0 / jnp.sqrt(jnp.float32(fan_in))
    weight = jax.random.uniform(kw, (Cout, Cin, K, K, K), jnp.float32, -bound, bound)
    bias = jax.random.uniform(kb, (Cout,), jnp.float32, -bound, bound)

    out = cna3d_forward(x, weight, bias)
    out = jax.block_until_ready(out)
    assert out.shape == (N, Cout, D, H, W)

    # Strict check: same bf16-quantized inputs (isolates kernel math from the
    # deliberate bf16 cast; bias is included in the reference and is cancelled
    # analytically by the instance norm).
    xq = x.astype(jnp.bfloat16).astype(jnp.float32)
    wq = weight.astype(jnp.bfloat16).astype(jnp.float32)
    ref_q = _reference(xq, wq, bias)
    assert jnp.allclose(out, ref_q, rtol=1e-3, atol=1e-3), "mismatch vs bf16-quantized reference"

    # Loose check vs. the full-precision reference (only bf16 input quantization differs).
    ref = _reference(x, weight, bias)
    assert jnp.allclose(out, ref, rtol=5e-2, atol=5e-2), "mismatch vs f32 reference"

    print("KERNEL_OK")
</pallas_src>

<mosaic_0001>
module attributes {stable_mosaic.version = 11 : i64} {
  func.func @_cna3d_kernel(%arg0: i32, %arg1: memref<1x4x1280xbf16, #tpu.memory_space<vmem>>, %arg2: memref<8x108xbf16, #tpu.memory_space<vmem>>, %arg3: memref<1x1024xf32, #tpu.memory_space<vmem>>, %arg4: memref<1x8x1024xf32, #tpu.memory_space<vmem>>, %arg5: memref<108x1024xf32, #tpu.memory_space<vmem>>) attributes {dimension_semantics = [#tpu.dimension_semantics<parallel>], iteration_bounds = array<i64: 2>, scalar_prefetch = 0 : i64, scratch_operands = 1 : i64, tpu.core_type = #tpu.core_type<tc>, window_params = [{transform_indices = @transform_0, window_bounds = array<i64: 1, 4, 1280>}, {pipeline_mode = #tpu.pipeline_mode<synchronous>, transform_indices = @transform_1, window_bounds = array<i64: 8, 108>}, {pipeline_mode = #tpu.pipeline_mode<synchronous>, transform_indices = @transform_2, window_bounds = array<i64: 1, 1024>}, {transform_indices = @transform_3, window_bounds = array<i64: 1, 8, 1024>}]} {
    %c0 = arith.constant 0 : index
    %c0_0 = arith.constant 0 : index
    %c0_1 = arith.constant 0 : index
    %0 = vector.load %arg1[%c0, %c0_0, %c0_1] : memref<1x4x1280xbf16, #tpu.memory_space<vmem>>, vector<1x4x1024xbf16>
    %1 = vector.shape_cast %0 : vector<1x4x1024xbf16> to vector<4x1024xbf16>
    %2 = arith.extf %1 : vector<4x1024xbf16> to vector<4x1024xf32>
    %c0_2 = arith.constant 0 : index
    %c0_3 = arith.constant 0 : index
    %3 = vector.load %arg5[%c0_2, %c0_3] : memref<108x1024xf32, #tpu.memory_space<vmem>>, vector<4x1024xf32>
    tpu.vector_store %arg5[%c0_2, %c0_3], %2 {strides = array<i32>} : memref<108x1024xf32, #tpu.memory_space<vmem>>, vector<4x1024xf32>,
    %c0_4 = arith.constant 0 : index
    %c0_5 = arith.constant 0 : index
    %c1 = arith.constant 1 : index
    %4 = vector.load %arg1[%c0_4, %c0_5, %c1] : memref<1x4x1280xbf16, #tpu.memory_space<vmem>>, vector<1x4x1024xbf16>
    %5 = vector.shape_cast %4 : vector<1x4x1024xbf16> to vector<4x1024xbf16>
    %6 = arith.extf %5 : vector<4x1024xbf16> to vector<4x1024xf32>
    %c4 = arith.constant 4 : index
    %c0_6 = arith.constant 0 : index
    %7 = vector.load %arg5[%c4, %c0_6] : memref<108x1024xf32, #tpu.memory_space<vmem>>, vector<4x1024xf32>
    tpu.vector_store %arg5[%c4, %c0_6], %6 {strides = array<i32>} : memref<108x1024xf32, #tpu.memory_space<vmem>>, vector<4x1024xf32>,
    %c0_7 = arith.constant 0 : index
    %c0_8 = arith.constant 0 : index
    %c2 = arith.constant 2 : index
    %8 = vector.load %arg1[%c0_7, %c0_8, %c2] : memref<1x4x1280xbf16, #tpu.memory_space<vmem>>, vector<1x4x1024xbf16>
    %9 = vector.shape_cast %8 : vector<1x4x1024xbf16> to vector<4x1024xbf16>
    %10 = arith.extf %9 : vector<4x1024xbf16> to vector<4x1024xf32>
    %c8 = arith.constant 8 : index
    %c0_9 = arith.constant 0 : index
    %11 = vector.load %arg5[%c8, %c0_9] : memref<108x1024xf32, #tpu.memory_space<vmem>>, vector<4x1024xf32>
    tpu.vector_store %arg5[%c8, %c0_9], %10 {strides = array<i32>} : memref<108x1024xf32, #tpu.memory_space<vmem>>, vector<4x1024xf32>,
    %c0_10 = arith.constant 0 : index
    %c0_11 = arith.constant 0 : index
    %c10 = arith.constant 10 : index
    %12 = vector.load %arg1[%c0_10, %c0_11, %c10] : memref<1x4x1280xbf16, #tpu.memory_space<vmem>>, vector<1x4x1024xbf16>
    %13 = vector.shape_cast %12 : vector<1x4x1024xbf16> to vector<4x1024xbf16>
    %14 = arith.extf %13 : vector<4x1024xbf16> to vector<4x1024xf32>
    %c12 = arith.constant 12 : index
    %c0_12 = arith.constant 0 : index
    %15 = vector.load %arg5[%c12, %c0_12] : memref<108x1024xf32, #tpu.memory_space<vmem>>, vector<4x1024xf32>
    tpu.vector_store %arg5[%c12, %c0_12], %14 {strides = array<i32>} : memref<108x1024xf32, #tpu.memory_space<vmem>>, vector<4x1024xf32>,
    %c0_13 = arith.constant 0 : index
    %c0_14 = arith.constant 0 : index
    %c11 = arith.constant 11 : index
    %16 = vector.load %arg1[%c0_13, %c0_14, %c11] : memref<1x4x1280xbf16, #tpu.memory_space<vmem>>, vector<1x4x1024xbf16>
    %17 = vector.shape_cast %16 : vector<1x4x1024xbf16> to vector<4x1024xbf16>
    %18 = arith.extf %17 : vector<4x1024xbf16> to vector<4x1024xf32>
    %c16 = arith.constant 16 : index
    %c0_15 = arith.constant 0 : index
    %19 = vector.load %arg5[%c16, %c0_15] : memref<108x1024xf32, #tpu.memory_space<vmem>>, vector<4x1024xf32>
    tpu.vector_store %arg5[%c16, %c0_15], %18 {strides = array<i32>} : memref<108x1024xf32, #tpu.memory_space<vmem>>, vector<4x1024xf32>,
    %c0_16 = arith.constant 0 : index
    %c0_17 = arith.constant 0 : index
    %c12_18 = arith.constant 12 : index
    %20 = vector.load %arg1[%c0_16, %c0_17, %c12_18] : memref<1x4x1280xbf16, #tpu.memory_space<vmem>>, vector<1x4x1024xbf16>
    %21 = vector.shape_cast %20 : vector<1x4x1024xbf16> to vector<4x1024xbf16>
    %22 = arith.extf %21 : vector<4x1024xbf16> to vector<4x1024xf32>
    %c20 = arith.constant 20 : index
    %c0_19 = arith.constant 0 : index
    %23 = vector.load %arg5[%c20, %c0_19] : memref<108x1024xf32, #tpu.memory_space<vmem>>, vector<4x1024xf32>
    tpu.vector_store %arg5[%c20, %c0_19], %22 {strides = array<i32>} : memref<108x1024xf32, #tpu.memory_space<vmem>>, vector<4x1024xf32>,
    %c0_20 = arith.constant 0 : index
    %c0_21 = arith.constant 0 : index
    %c20_22 = arith.constant 20 : index
    %24 = vector.load %arg1[%c0_20, %c0_21, %c20_22] : memref<1x4x1280xbf16, #tpu.memory_space<vmem>>, vector<1x4x1024xbf16>
    %25 = vector.shape_cast %24 : vector<1x4x1024xbf16> to vector<4x1024xbf16>
    %26 = arith.extf %25 : vector<4x1024xbf16> to vector<4x1024xf32>
    %c24 = arith.constant 24 : index
    %c0_23 = arith.constant 0 : index
    %27 = vector.load %arg5[%c24, %c0_23] : memref<108x1024xf32, #tpu.memory_space<vmem>>, vector<4x1024xf32>
    tpu.vector_store %arg5[%c24, %c0_23], %26 {strides = array<i32>} : memref<108x1024xf32, #tpu.memory_space<vmem>>, vector<4x1024xf32>,
    %c0_24 = arith.constant 0 : index
    %c0_25 = arith.constant 0 : index
    %c21 = arith.constant 21 : index
    %28 = vector.load %arg1[%c0_24, %c0_25, %c21] : memref<1x4x1280xbf16, #tpu.memory_space<vmem>>, vector<1x4x1024xbf16>
    %29 = vector.shape_cast %28 : vector<1x4x1024xbf16> to vector<4x1024xbf16>
    %30 = arith.extf %29 : vector<4x1024xbf16> to vector<4x1024xf32>
    %c28 = arith.constant 28 : index
    %c0_26 = arith.constant 0 : index
    %31 = vector.load %arg5[%c28, %c0_26] : memref<108x1024xf32, #tpu.memory_space<vmem>>, vector<4x1024xf32>
    tpu.vector_store %arg5[%c28, %c0_26], %30 {strides = array<i32>} : memref<108x1024xf32, #tpu.memory_space<vmem>>, vector<4x1024xf32>,
    %c0_27 = arith.constant 0 : index
    %c0_28 = arith.constant 0 : index
    %c22 = arith.constant 22 : index
    %32 = vector.load %arg1[%c0_27, %c0_28, %c22] : memref<1x4x1280xbf16, #tpu.memory_space<vmem>>, vector<1x4x1024xbf16>
    %33 = vector.shape_cast %32 : vector<1x4x1024xbf16> to vector<4x1024xbf16>
    %34 = arith.extf %33 : vector<4x1024xbf16> to vector<4x1024xf32>
    %c32 = arith.constant 32 : index
    %c0_29 = arith.constant 0 : index
    %35 = vector.load %arg5[%c32, %c0_29] : memref<108x1024xf32, #tpu.memory_space<vmem>>, vector<4x1024xf32>
    tpu.vector_store %arg5[%c32, %c0_29], %34 {strides = array<i32>} : memref<108x1024xf32, #tpu.memory_space<vmem>>, vector<4x1024xf32>,
    %c0_30 = arith.constant 0 : index
    %c0_31 = arith.constant 0 : index
    %c100 = arith.constant 100 : index
    %36 = vector.load %arg1[%c0_30, %c0_31, %c100] : memref<1x4x1280xbf16, #tpu.memory_space<vmem>>, vector<1x4x1024xbf16>
    %37 = vector.shape_cast %36 : vector<1x4x1024xbf16> to vector<4x1024xbf16>
    %38 = arith.extf %37 : vector<4x1024xbf16> to vector<4x1024xf32>
    %c36 = arith.constant 36 : index
    %c0_32 = arith.constant 0 : index
    %39 = vector.load %arg5[%c36, %c0_32] : memref<108x1024xf32, #tpu.memory_space<vmem>>, vector<4x1024xf32>
    tpu.vector_store %arg5[%c36, %c0_32], %38 {strides = array<i32>} : memref<108x1024xf32, #tpu.memory_space<vmem>>, vector<4x1024xf32>,
    %c0_33 = arith.constant 0 : index
    %c0_34 = arith.constant 0 : index
    %c101 = arith.constant 101 : index
    %40 = vector.load %arg1[%c0_33, %c0_34, %c101] : memref<1x4x1280xbf16, #tpu.memory_space<vmem>>, vector<1x4x1024xbf16>
    %41 = vector.shape_cast %40 : vector<1x4x1024xbf16> to vector<4x1024xbf16>
    %42 = arith.extf %41 : vector<4x1024xbf16> to vector<4x1024xf32>
    %c40 = arith.constant 40 : index
    %c0_35 = arith.constant 0 : index
    %43 = vector.load %arg5[%c40, %c0_35] : memref<108x1024xf32, #tpu.memory_space<vmem>>, vector<4x1024xf32>
    tpu.vector_store %arg5[%c40, %c0_35], %42 {strides = array<i32>} : memref<108x1024xf32, #tpu.memory_space<vmem>>, vector<4x1024xf32>,
    %c0_36 = arith.constant 0 : index
    %c0_37 = arith.constant 0 : index
    %c102 = arith.constant 102 : index
    %44 = vector.load %arg1[%c0_36, %c0_37, %c102] : memref<1x4x1280xbf16, #tpu.memory_space<vmem>>, vector<1x4x1024xbf16>
    %45 = vector.shape_cast %44 : vector<1x4x1024xbf16> to vector<4x1024xbf16>
    %46 = arith.extf %45 : vector<4x1024xbf16> to vector<4x1024xf32>
    %c44 = arith.constant 44 : index
    %c0_38 = arith.constant 0 : index
    %47 = vector.load %arg5[%c44, %c0_38] : memref<108x1024xf32, #tpu.memory_space<vmem>>, vector<4x1024xf32>
    tpu.vector_store %arg5[%c44, %c0_38], %46 {strides = array<i32>} : memref<108x1024xf32, #tpu.memory_space<vmem>>, vector<4x1024xf32>,
    %c0_39 = arith.constant 0 : index
    %c0_40 = arith.constant 0 : index
    %c110 = arith.constant 110 : index
    %48 = vector.load %arg1[%c0_39, %c0_40, %c110] : memref<1x4x1280xbf16, #tpu.memory_space<vmem>>, vector<1x4x1024xbf16>
    %49 = vector.shape_cast %48 : vector<1x4x1024xbf16> to vector<4x1024xbf16>
    %50 = arith.extf %49 : vector<4x1024xbf16> to vector<4x1024xf32>
    %c48 = arith.constant 48 : index
    %c0_41 = arith.constant 0 : index
    %51 = vector.load %arg5[%c48, %c0_41] : memref<108x1024xf32, #tpu.memory_space<vmem>>, vector<4x1024xf32>
    tpu.vector_store %arg5[%c48, %c0_41], %50 {strides = array<i32>} : memref<108x1024xf32, #tpu.memory_space<vmem>>, vector<4x1024xf32>,
    %c0_42 = arith.constant 0 : index
    %c0_43 = arith.constant 0 : index
    %c111 = arith.constant 111 : index
    %52 = vector.load %arg1[%c0_42, %c0_43, %c111] : memref<1x4x1280xbf16, #tpu.memory_space<vmem>>, vector<1x4x1024xbf16>
    %53 = vector.shape_cast %52 : vector<1x4x1024xbf16> to vector<4x1024xbf16>
    %54 = arith.extf %53 : vector<4x1024xbf16> to vector<4x1024xf32>
    %c52 = arith.constant 52 : index
    %c0_44 = arith.constant 0 : index
    %55 = vector.load %arg5[%c52, %c0_44] : memref<108x1024xf32, #tpu.memory_space<vmem>>, vector<4x1024xf32>
    tpu.vector_store %arg5[%c52, %c0_44], %54 {strides = array<i32>} : memref<108x1024xf32, #tpu.memory_space<vmem>>, vector<4x1024xf32>,
    %c0_45 = arith.constant 0 : index
    %c0_46 = arith.constant 0 : index
    %c112 = arith.constant 112 : index
    %56 = vector.load %arg1[%c0_45, %c0_46, %c112] : memref<1x4x1280xbf16, #tpu.memory_space<vmem>>, vector<1x4x1024xbf16>
    %57 = vector.shape_cast %56 : vector<1x4x1024xbf16> to vector<4x1024xbf16>
    %58 = arith.extf %57 : vector<4x1024xbf16> to vector<4x1024xf32>
    %c56 = arith.constant 56 : index
    %c0_47 = arith.constant 0 : index
    %59 = vector.load %arg5[%c56, %c0_47] : memref<108x1024xf32, #tpu.memory_space<vmem>>, vector<4x1024xf32>
    tpu.vector_store %arg5[%c56, %c0_47], %58 {strides = array<i32>} : memref<108x1024xf32, #tpu.memory_space<vmem>>, vector<4x1024xf32>,
    %c0_48 = arith.constant 0 : index
    %c0_49 = arith.constant 0 : index
    %c120 = arith.constant 120 : index
    %60 = vector.load %arg1[%c0_48, %c0_49, %c120] : memref<1x4x1280xbf16, #tpu.memory_space<vmem>>, vector<1x4x1024xbf16>
    %61 = vector.shape_cast %60 : vector<1x4x1024xbf16> to vector<4x1024xbf16>
    %62 = arith.extf %61 : vector<4x1024xbf16> to vector<4x1024xf32>
    %c60 = arith.constant 60 : index
    %c0_50 = arith.constant 0 : index
    %63 = vector.load %arg5[%c60, %c0_50] : memref<108x1024xf32, #tpu.memory_space<vmem>>, vector<4x1024xf32>
    tpu.vector_store %arg5[%c60, %c0_50], %62 {strides = array<i32>} : memref<108x1024xf32, #tpu.memory_space<vmem>>, vector<4x1024xf32>,
    %c0_51 = arith.constant 0 : index
    %c0_52 = arith.constant 0 : index
    %c121 = arith.constant 121 : index
    %64 = vector.load %arg1[%c0_51, %c0_52, %c121] : memref<1x4x1280xbf16, #tpu.memory_space<vmem>>, vector<1x4x1024xbf16>
    %65 = vector.shape_cast %64 : vector<1x4x1024xbf16> to vector<4x1024xbf16>
    %66 = arith.extf %65 : vector<4x1024xbf16> to vector<4x1024xf32>
    %c64 = arith.constant 64 : index
    %c0_53 = arith.constant 0 : index
    %67 = vector.load %arg5[%c64, %c0_53] : memref<108x1024xf32, #tpu.memory_space<vmem>>, vector<4x1024xf32>
    tpu.vector_store %arg5[%c64, %c0_53], %66 {strides = array<i32>} : memref<108x1024xf32, #tpu.memory_space<vmem>>, vector<4x1024xf32>,
    %c0_54 = arith.constant 0 : index
    %c0_55 = arith.constant 0 : index
    %c122 = arith.constant 122 : index
    %68 = vector.load %arg1[%c0_54, %c0_55, %c122] : memref<1x4x1280xbf16, #tpu.memory_space<vmem>>, vector<1x4x1024xbf16>
    %69 = vector.shape_cast %68 : vector<1x4x1024xbf16> to vector<4x1024xbf16>
    %70 = arith.extf %69 : vector<4x1024xbf16> to vector<4x1024xf32>
    %c68 = arith.constant 68 : index
    %c0_56 = arith.constant 0 : index
    %71 = vector.load %arg5[%c68, %c0_56] : memref<108x1024xf32, #tpu.memory_space<vmem>>, vector<4x1024xf32>
    tpu.vector_store %arg5[%c68, %c0_56], %70 {strides = array<i32>} : memref<108x1024xf32, #tpu.memory_space<vmem>>, vector<4x1024xf32>,
    %c0_57 = arith.constant 0 : index
    %c0_58 = arith.constant 0 : index
    %c200 = arith.constant 200 : index
    %72 = vector.load %arg1[%c0_57, %c0_58, %c200] : memref<1x4x1280xbf16, #tpu.memory_space<vmem>>, vector<1x4x1024xbf16>
    %73 = vector.shape_cast %72 : vector<1x4x1024xbf16> to vector<4x1024xbf16>
    %74 = arith.extf %73 : vector<4x1024xbf16> to vector<4x1024xf32>
    %c72 = arith.constant 72 : index
    %c0_59 = arith.constant 0 : index
    %75 = vector.load %arg5[%c72, %c0_59] : memref<108x1024xf32, #tpu.memory_space<vmem>>, vector<4x1024xf32>
    tpu.vector_store %arg5[%c72, %c0_59], %74 {strides = array<i32>} : memref<108x1024xf32, #tpu.memory_space<vmem>>, vector<4x1024xf32>,
    %c0_60 = arith.constant 0 : index
    %c0_61 = arith.constant 0 : index
    %c201 = arith.constant 201 : index
    %76 = vector.load %arg1[%c0_60, %c0_61, %c201] : memref<1x4x1280xbf16, #tpu.memory_space<vmem>>, vector<1x4x1024xbf16>
    %77 = vector.shape_cast %76 : vector<1x4x1024xbf16> to vector<4x1024xbf16>
    %78 = arith.extf %77 : vector<4x1024xbf16> to vector<4x1024xf32>
    %c76 = arith.constant 76 : index
    %c0_62 = arith.constant 0 : index
    %79 = vector.load %arg5[%c76, %c0_62] : memref<108x1024xf32, #tpu.memory_space<vmem>>, vector<4x1024xf32>
    tpu.vector_store %arg5[%c76, %c0_62], %78 {strides = array<i32>} : memref<108x1024xf32, #tpu.memory_space<vmem>>, vector<4x1024xf32>,
    %c0_63 = arith.constant 0 : index
    %c0_64 = arith.constant 0 : index
    %c202 = arith.constant 202 : index
    %80 = vector.load %arg1[%c0_63, %c0_64, %c202] : memref<1x4x1280xbf16, #tpu.memory_space<vmem>>, vector<1x4x1024xbf16>
    %81 = vector.shape_cast %80 : vector<1x4x1024xbf16> to vector<4x1024xbf16>
    %82 = arith.extf %81 : vector<4x1024xbf16> to vector<4x1024xf32>
    %c80 = arith.constant 80 : index
    %c0_65 = arith.constant 0 : index
    %83 = vector.load %arg5[%c80, %c0_65] : memref<108x1024xf32, #tpu.memory_space<vmem>>, vector<4x1024xf32>
    tpu.vector_store %arg5[%c80, %c0_65], %82 {strides = array<i32>} : memref<108x1024xf32, #tpu.memory_space<vmem>>, vector<4x1024xf32>,
    %c0_66 = arith.constant 0 : index
    %c0_67 = arith.constant 0 : index
    %c210 = arith.constant 210 : index
    %84 = vector.load %arg1[%c0_66, %c0_67, %c210] : memref<1x4x1280xbf16, #tpu.memory_space<vmem>>, vector<1x4x1024xbf16>
    %85 = vector.shape_cast %84 : vector<1x4x1024xbf16> to vector<4x1024xbf16>
    %86 = arith.extf %85 : vector<4x1024xbf16> to vector<4x1024xf32>
    %c84 = arith.constant 84 : index
    %c0_68 = arith.constant 0 : index
    %87 = vector.load %arg5[%c84, %c0_68] : memref<108x1024xf32, #tpu.memory_space<vmem>>, vector<4x1024xf32>
    tpu.vector_store %arg5[%c84, %c0_68], %86 {strides = array<i32>} : memref<108x1024xf32, #tpu.memory_space<vmem>>, vector<4x1024xf32>,
    %c0_69 = arith.constant 0 : index
    %c0_70 = arith.constant 0 : index
    %c211 = arith.constant 211 : index
    %88 = vector.load %arg1[%c0_69, %c0_70, %c211] : memref<1x4x1280xbf16, #tpu.memory_space<vmem>>, vector<1x4x1024xbf16>
    %89 = vector.shape_cast %88 : vector<1x4x1024xbf16> to vector<4x1024xbf16>
    %90 = arith.extf %89 : vector<4x1024xbf16> to vector<4x1024xf32>
    %c88 = arith.constant 88 : index
    %c0_71 = arith.constant 0 : index
    %91 = vector.load %arg5[%c88, %c0_71] : memref<108x1024xf32, #tpu.memory_space<vmem>>, vector<4x1024xf32>
    tpu.vector_store %arg5[%c88, %c0_71], %90 {strides = array<i32>} : memref<108x1024xf32, #tpu.memory_space<vmem>>, vector<4x1024xf32>,
    %c0_72 = arith.constant 0 : index
    %c0_73 = arith.constant 0 : index
    %c212 = arith.constant 212 : index
    %92 = vector.load %arg1[%c0_72, %c0_73, %c212] : memref<1x4x1280xbf16, #tpu.memory_space<vmem>>, vector<1x4x1024xbf16>
    %93 = vector.shape_cast %92 : vector<1x4x1024xbf16> to vector<4x1024xbf16>
    %94 = arith.extf %93 : vector<4x1024xbf16> to vector<4x1024xf32>
    %c92 = arith.constant 92 : index
    %c0_74 = arith.constant 0 : index
    %95 = vector.load %arg5[%c92, %c0_74] : memref<108x1024xf32, #tpu.memory_space<vmem>>, vector<4x1024xf32>
    tpu.vector_store %arg5[%c92, %c0_74], %94 {strides = array<i32>} : memref<108x1024xf32, #tpu.memory_space<vmem>>, vector<4x1024xf32>,
    %c0_75 = arith.constant 0 : index
    %c0_76 = arith.constant 0 : index
    %c220 = arith.constant 220 : index
    %96 = vector.load %arg1[%c0_75, %c0_76, %c220] : memref<1x4x1280xbf16, #tpu.memory_space<vmem>>, vector<1x4x1024xbf16>
    %97 = vector.shape_cast %96 : vector<1x4x1024xbf16> to vector<4x1024xbf16>
    %98 = arith.extf %97 : vector<4x1024xbf16> to vector<4x1024xf32>
    %c96 = arith.constant 96 : index
    %c0_77 = arith.constant 0 : index
    %99 = vector.load %arg5[%c96, %c0_77] : memref<108x1024xf32, #tpu.memory_space<vmem>>, vector<4x1024xf32>
    tpu.vector_store %arg5[%c96, %c0_77], %98 {strides = array<i32>} : memref<108x1024xf32, #tpu.memory_space<vmem>>, vector<4x1024xf32>,
    %c0_78 = arith.constant 0 : index
    %c0_79 = arith.constant 0 : index
    %c221 = arith.constant 221 : index
    %100 = vector.load %arg1[%c0_78, %c0_79, %c221] : memref<1x4x1280xbf16, #tpu.memory_space<vmem>>, vector<1x4x1024xbf16>
    %101 = vector.shape_cast %100 : vector<1x4x1024xbf16> to vector<4x1024xbf16>
    %102 = arith.extf %101 : vector<4x1024xbf16> to vector<4x1024xf32>
    %c100_80 = arith.constant 100 : index
    %c0_81 = arith.constant 0 : index
    %103 = vector.load %arg5[%c100_80, %c0_81] : memref<108x1024xf32, #tpu.memory_space<vmem>>, vector<4x1024xf32>
    tpu.vector_store %arg5[%c100_80, %c0_81], %102 {strides = array<i32>} : memref<108x1024xf32, #tpu.memory_space<vmem>>, vector<4x1024xf32>,
    %c0_82 = arith.constant 0 : index
    %c0_83 = arith.constant 0 : index
    %c222 = arith.constant 222 : index
    %104 = vector.load %arg1[%c0_82, %c0_83, %c222] : memref<1x4x1280xbf16, #tpu.memory_space<vmem>>, vector<1x4x1024xbf16>
    %105 = vector.shape_cast %104 : vector<1x4x1024xbf16> to vector<4x1024xbf16>
    %106 = arith.extf %105 : vector<4x1024xbf16> to vector<4x1024xf32>
    %c104 = arith.constant 104 : index
    %c0_84 = arith.constant 0 : index
    %107 = vector.load %arg5[%c104, %c0_84] : memref<108x1024xf32, #tpu.memory_space<vmem>>, vector<4x1024xf32>
    tpu.vector_store %arg5[%c104, %c0_84], %106 {strides = array<i32>} : memref<108x1024xf32, #tpu.memory_space<vmem>>, vector<4x1024xf32>,
    %c0_85 = arith.constant 0 : index
    %c0_86 = arith.constant 0 : index
    %108 = vector.load %arg2[%c0_85, %c0_86] : memref<8x108xbf16, #tpu.memory_space<vmem>>, vector<8x108xbf16>
    %109 = arith.extf %108 : vector<8x108xbf16> to vector<8x108xf32>
    %c0_87 = arith.constant 0 : index
    %c0_88 = arith.constant 0 : index
    %110 = vector.load %arg5[%c0_87, %c0_88] : memref<108x1024xf32, #tpu.memory_space<vmem>>, vector<108x1024xf32>
    %cst = arith.constant dense<0.000000e+00> : vector<8x1024xf32>
    %111 = tpu.matmul %109, %110, %cst {dimension_numbers = #tpu.dot_dimension_numbers<[1], [0], [0], [1], [0, 0, 1, 1], [], []>} : vector<8x108xf32>, vector<108x1024xf32>, vector<8x1024xf32> -> vector<8x1024xf32>
    %c0_89 = arith.constant 0 : index
    %c0_90 = arith.constant 0 : index
    %112 = vector.load %arg3[%c0_89, %c0_90] : memref<1x1024xf32, #tpu.memory_space<vmem>>, vector<1x1024xf32>
    %113 = vector.broadcast %112 : vector<1x1024xf32> to vector<8x1024xf32>
    %114 = arith.mulf %111, %113 : vector<8x1024xf32>
    %cst_91 = arith.constant dense<0.000000e+00> : vector<8xf32>
    %115 = vector.multi_reduction <add>, %114, %cst_91 [1] : vector<8x1024xf32> to vector<8xf32>
    %116 = vector.shape_cast %115 : vector<8xf32> to vector<8x1xf32>
    %117 = arith.mulf %111, %111 : vector<8x1024xf32>
    %118 = vector.broadcast %112 : vector<1x1024xf32> to vector<8x1024xf32>
    %119 = arith.mulf %117, %118 : vector<8x1024xf32>
    %cst_92 = arith.constant dense<0.000000e+00> : vector<8xf32>
    %120 = vector.multi_reduction <add>, %119, %cst_92 [1] : vector<8x1024xf32> to vector<8xf32>
    %121 = vector.shape_cast %120 : vector<8xf32> to vector<8x1xf32>
    %cst_93 = arith.constant 0.001953125 : f32
    %122 = vector.broadcast %cst_93 : f32 to vector<8x1xf32>
    %123 = arith.mulf %116, %122 : vector<8x1xf32>
    %cst_94 = arith.constant 0.001953125 : f32
    %124 = vector.broadcast %cst_94 : f32 to vector<8x1xf32>
    %125 = arith.mulf %121, %124 : vector<8x1xf32>
    %126 = arith.mulf %123, %123 : vector<8x1xf32>
    %127 = arith.subf %125, %126 : vector<8x1xf32>
    %cst_95 = arith.constant 0.000000e+00 : f32
    %128 = vector.broadcast %cst_95 : f32 to vector<8x1xf32>
    %129 = arith.maximumf %127, %128 : vector<8x1xf32>
    %130 = vector.broadcast %123 : vector<8x1xf32> to vector<8x1024xf32>
    %131 = arith.subf %111, %130 : vector<8x1024xf32>
    %cst_96 = arith.constant 9.99999974E-6 : f32
    %132 = vector.broadcast %cst_96 : f32 to vector<8x1xf32>
    %133 = arith.addf %129, %132 : vector<8x1xf32>
    %134 = math.rsqrt %133 : vector<8x1xf32>
    %135 = vector.broadcast %134 : vector<8x1xf32> to vector<8x1024xf32>
    %136 = arith.mulf %131, %135 : vector<8x1024xf32>
    %cst_97 = arith.constant 0.000000e+00 : f32
    %137 = vector.broadcast %cst_97 : f32 to vector<8x1024xf32>
    %138 = arith.cmpf oge, %136, %137 : vector<8x1024xf32>
    %cst_98 = arith.constant 0.00999999977 : f32
    %139 = vector.broadcast %cst_98 : f32 to vector<8x1024xf32>
    %140 = arith.mulf %139, %136 : vector<8x1024xf32>
    %141 = arith.select %138, %136, %140 : vector<8x1024xi1>, vector<8x1024xf32>
    %142 = vector.shape_cast %141 : vector<8x1024xf32> to vector<1x8x1024xf32>
    %c0_99 = arith.constant 0 : index
    %c0_100 = arith.constant 0 : index
    %c0_101 = arith.constant 0 : index
    %143 = vector.load %arg4[%c0_99, %c0_100, %c0_101] : memref<1x8x1024xf32, #tpu.memory_space<vmem>>, vector<1x8x1024xf32>
    tpu.vector_store %arg4[%c0_99, %c0_100, %c0_101], %142 {strides = array<i32>} : memref<1x8x1024xf32, #tpu.memory_space<vmem>>, vector<1x8x1024xf32>,
    return
  }
  func.func @transform_0(%arg0: i32) -> (i32, i32, i32) {
    %c0_i32 = arith.constant 0 : i32
    %c0_i32_0 = arith.constant 0 : i32
    %c0_i32_1 = arith.constant 0 : i32
    return %arg0, %c0_i32, %c0_i32_0 : i32, i32, i32
  }
  func.func @transform_1(%arg0: i32) -> (i32, i32) {
    %c0_i32 = arith.constant 0 : i32
    %c0_i32_0 = arith.constant 0 : i32
    %c0_i32_1 = arith.constant 0 : i32
    return %c0_i32, %c0_i32_0 : i32, i32
  }
  func.func @transform_2(%arg0: i32) -> (i32, i32) {
    %c0_i32 = arith.constant 0 : i32
    %c0_i32_0 = arith.constant 0 : i32
    %c0_i32_1 = arith.constant 0 : i32
    return %c0_i32, %c0_i32_0 : i32, i32
  }
  func.func @transform_3(%arg0: i32) -> (i32, i32, i32) {
    %c0_i32 = arith.constant 0 : i32
    %c0_i32_0 = arith.constant 0 : i32
    %c0_i32_1 = arith.constant 0 : i32
    return %arg0, %c0_i32, %c0_i32_0 : i32, i32, i32
  }
}

</mosaic_0001>

<bundles_post_ra>
// kernel: tpu_custom_call.1
= control target key start
LH: loop header
LB: loop body
LE: loop exit
PB: predicated region body
PF: predicated region fallthrough
CT: control target
= control target key end

     0   :  { %8 = vsyncpa [#allocation4], 0  ;;  %s4521_s0 = inlined_call_operand.hbm [shape: bf16[2,4,1280], index: 0, kind: input, shape index: {}]   ;;  %s4522_s1 = inlined_call_operand.hbm [shape: bf16[8,108], index: 1, kind: input, shape index: {}]   ;;  %s4523_s2 = inlined_call_operand.hbm [shape: f32[1,1024], index: 2, kind: input, shape index: {}]   ;;  %s4524_s3 = inlined_call_operand.hbm [shape: f32[2,8,1024], index: 3, kind: output, shape index: {}]  }
   0x1   :  { %10 = vsyncpa [#allocation4 + $0x1], 0 }
   0x2   :  { %11 = vsyncpa [#allocation7], 0 }
   0x3   :  { %12 = vsyncpa [#allocation5], 0 }
   0x4   :  { %14 = vsyncpa [#allocation5 + $0x1], 0  ;;  %s3328_s12 = smov 0   ;;  %s3330_s13 = smov 0  }
   0x5   :  { %s3332_s14 = smov 0   ;;  %s3334_s15 = smov 0  }
   0x6 LB: > { %s3349_s16 = sadd.s32 4294967295, %s3275_s15   ;;  %s2480_s17 = sadd.s32 4294967294, %s3275_s15   ;;  %s3275_s15 = sphi %s3334_s15, %s4597_s15   ;;  %s3271_s14 = sphi %s3332_s14, %s4596_s14   ;;  %s3267_s13 = sphi %s3330_s13, %s4595_s13   ;;  %s3263_s12 = sphi %s3328_s12, %s4594_s12  }
   0x7   : > { %p40_p0 = scmp.ne.s32.totalorder %s3267_s13, %s3263_s12  ;;  %p4525_p1 = scmp.eq.s32.totalorder %s3349_s16, 0 }
   0x8   : > { %p112_p3 = scmp.eq.s32.totalorder %s2480_s17, 1  ;;  %p2481_p5 = scmp.ge.s32.totalorder %s3275_s15, 1 }
   0x9   : > { %p3358_p4 = por %p4525_p1, %p40_p0  ;;  %p119_p7 = scmp.lt.s32.totalorder %s3275_s15, 3 }
   0xa   : > { %p3363_p6 = por %p112_p3, %p40_p0  ;;  %s3277_s21 = smov [#allocation6]  }
   0xb   : > { %s4551_s18 = scalar_select %p3358_p4, 1, 0 }
   0xc   : > { %s4552_s19 = scalar_select %p3363_p6, 1, 0 }
   0xd   : > { %p3368_p8 = pnand %p2481_p5, %p119_p7  ;;  %s132_s22 = sshll.u32 %s3277_s21, 4  ;;  %s133_s22 = int_to_ptr.vmem [resolvable:$true] %s132_s22 }
   0xe   : > { %s3278_s23 = smov [#allocation8]   ;;  %s3382_s26 = sadd.s32 1, %s3275_s15  }
   0xf   : > { %s4553_s20 = scalar_select %p3368_p8, 1, 0 }
  0x10   : > { %p2523_p10 = pneg %p3368_p8  ;;  %s143_s24 = sshll.u32 %s3278_s23, 4  ;;  %s144_s24 = int_to_ptr.vmem [resolvable:$true] %s143_s24 }
  0x11   : > { %s24_s27 = ssub.s32 %s3275_s15, %s3382_s26  ;;  %s3138_s28 = scalar_lea.vmem %s133_s22, 64 }
  0x12   : > { %p3377_p11 = pnand %p2523_p10, %p4525_p1  ;;  %p3139_p13 = scmp.ne.s32.totalorder %s133_s22, %s3138_s28 }
  0x13   : > { %p3146_p5 = scmp.lt.s32.totalorder %s133_s22, %s133_s22  ;;  %p3147_p7 = scmp.lt.s32.totalorder %s3138_s28, %s3138_s28 }
  0x14   : > { %p3129_p12 = pneg %p3377_p11 }
  0x15   : > { %p3148_p10 = por %p3147_p7, %p3146_p5 }
  0x16   : > { %p3141_p0 = pnand %p3139_p13, %p3129_p12 }
  0x18   : > { %p3142_p3 = pneg %p3141_p0 }
  0x1a   : > { %p3149_p9 = pnand %p3148_p10, %p3142_p3 }
  0x1c   : > { %3152 = shalt.err (!%p3149_p9)
}
  0x1d   : > { %2526 = dma.hbm_to_vmem [thread:$0]  (!%p3377_p11), %s4522_s1, 64, %s133_s22, [#allocation7]  }
  0x1e   : > { %s3164_s4 = scalar_lea.vmem %s144_s24, 128  ;;  %p3172_p13 = scmp.lt.s32.totalorder %s144_s24, %s144_s24 }
  0x1f   : > { %p3165_p1 = scmp.ne.s32.totalorder %s144_s24, %s3164_s4  ;;  %p3173_p0 = scmp.lt.s32.totalorder %s3164_s4, %s3164_s4 }
  0x21   : > { %p3167_p2 = pnand %p3165_p1, %p3129_p12  ;;  %p3174_p4 = por %p3173_p0, %p3172_p13 }
  0x23   : > { %p3168_p6 = pneg %p3167_p2 }
  0x25   : > { %p3175_p8 = pnand %p3174_p4, %p3168_p6 }
  0x27   : > { %3178 = shalt.err (!%p3175_p8)
}
  0x28   : > { %2529 = dma.hbm_to_vmem [thread:$0]  (!%p3377_p11), %s4523_s2, 128, %s144_s24, [#allocation7]  }
  0x29   : > { %p25_p1 = scmp.eq.s32.totalorder %s24_s27, 0  ;;  %s27_s7 = sadd.s32 1, %s3271_s14 }
  0x2a   : > { %p34_p2 = scmp.ne.s32.totalorder %s3271_s14, %s3267_s13  ;;  %p35_p4 = scmp.eq.s32.totalorder %s3275_s15, 0 }
  0x2b   : > { %s3409_s8 = scalar_select %p25_p1, %s3271_s14, %s27_s7  }
  0x2c   : > { %p36_p6 = por %p35_p4, %p34_p2  ;;  %p4555_p8 = scmp.eq.s32.totalorder %s3349_s16, 1 }
  0x2d   : > { %p2540_p12 = scmp.lt.s32.totalorder %s3275_s15, 2  ;;  %s154_s10 = sand.u32 1, %s3271_s14  }
  0x2e   : > { %p3413_p9 = por %p4555_p8, %p34_p2  ;;  %s2508_s11 = smul.u32 20, %s154_s10 }
  0x2f   : > { %s2509_s17 = smul.u32 320, %s3275_s15  ;;  %p3420_p3 = pnand %p2540_p12, %p36_p6 }
  0x30   : > { %s4556_s9 = scalar_select %p3413_p9, 1, 0 }
  0x31   : > { %s3427_s24 = scalar_lea.hbm %s4521_s0, %s2509_s17  ;;  %s158_s25 = scalar_lea.vmem [#allocation3], %s2508_s11 }
  0x32   : > { %s166_s27 = sshll.u32 %s158_s25, 4  ;;  %s155_s28 = scalar_lea.sflag [#allocation4], %s154_s10  ;;  %s167_s27 = int_to_ptr.vmem [resolvable:$true] %s166_s27 }
  0x33   : > { %s3179_s29 = scalar_lea.hbm %s3427_s24, 320  ;;  %p3181_p5 = pneg %p3420_p3 }
  0x34   : > { %p3180_p11 = scmp.ne.s32.totalorder %s3427_s24, %s3179_s29  ;;  %s3184_s5 = scalar_lea.hbm %s4521_s0, 640 }
  0x35   : > { %p3185_p13 = scmp.lt.s32.totalorder %s3427_s24, %s4521_s0  ;;  %p3186_p0 = scmp.lt.s32.totalorder %s3184_s5, %s3179_s29 }
  0x36   : > { %p3182_p7 = pnand %p3181_p5, %p3180_p11 }
  0x37   : > { %p3187_p1 = por %p3186_p0, %p3185_p13 }
  0x38   : > { %p3183_p10 = pneg %p3182_p7 }
  0x3a   : > { %p3188_p2 = pnand %p3187_p1, %p3183_p10 }
  0x3c   : > { %3191 = shalt.err (!%p3188_p2)
}
  0x3d   : > { %s3192_s11 = scalar_lea.vmem %s167_s27, 320  ;;  %s3279_s10 = smov [#allocation3]  }
  0x3e   : > { %p3193_p4 = scmp.ne.s32.totalorder %s167_s27, %s3192_s11  ;;  %s3197_s17 = sshll.u32 %s3279_s10, 4  ;;  %s3198_s17 = int_to_ptr.vmem [resolvable:$false] %s3197_s17 }
  0x3f   : > { %s3199_s22 = scalar_lea.vmem %s3198_s17, 640  ;;  %p3200_p12 = scmp.lt.s32.totalorder %s167_s27, %s3198_s17 }
  0x40   : > { %p3195_p6 = pnand %p3193_p4, %p3181_p5  ;;  %p3201_p11 = scmp.lt.s32.totalorder %s3199_s22, %s3192_s11 }
  0x42   : > { %p3196_p8 = pneg %p3195_p6  ;;  %p3202_p7 = por %p3201_p11, %p3200_p12 }
  0x44   : > { %p3203_p9 = pnand %p3202_p7, %p3196_p8 }
  0x46   : > { %3206 = shalt.err (!%p3203_p9)
}
  0x47   : > { %2533 = dma.hbm_to_vmem [thread:$0]  (!%p3420_p3), %s3427_s24, 320, %s167_s27, %s155_s28  }
  0x48   : > { %p4558_p10 = scmp.ne.s32.totalorder %s4553_s20, 0 }
  0x49   : > { %s3446_s23 = sand.u32 (!%p4558_p10), 1, %s3267_s13   ;;  %p4559_p5 = scmp.ne.s32.totalorder (!%p4558_p10), %s4551_s18, 0 }
  0x4a   : > { %175 = sbr.rel (%p4558_p10) target bundleno = 863 (0x35f), region = 32  ;;  %s178_s29 = scalar_lea.sflag (!%p4558_p10), [#allocation4], %s3446_s23 }
  0x4b   : > { %s2510_s25 = smul.u32 (!%p4558_p10), 20, %s3446_s23 }
  0x4d   : > { %s3450_s30 = scalar_lea.vmem (!%p4558_p10), [#allocation3], %s2510_s25 }
  0x4f   : > { %3250 = dma.done.wait (%p4559_p5), %s178_s29, 320  }
  0x50   : > { %3252 = vsyncadd (%p4559_p5), %s178_s29, 4294966976  ;;  %p4560_p9 = scmp.eq.s32.totalorder %s3349_s16, 0 }
  0x52   : > { %3254 = dma.done.wait (%p4560_p9), [#allocation7], 192   ;;  %p4561_p3 = pmov %p4560_p9 }
  0x53   : > { %v239_v0 = vld [vmem:[%s3450_s30 + $0x8] sm:$0xff]  ;;  %v238_v1 = vld [vmem:[%s3450_s30] sm:$0xff]  ;;  %v240_v10 = vld [vmem:[%s3450_s30 + $0x10] sm:$0x3]  ;;  %s3280_s18 = smov 127   ;;  %s3281_s20 = smov 126  }
  0x54   : > { %3256 = vsyncadd (%p4561_p3), [#allocation7], 4294967104  ;;  %v243_v2 = vunpack.c.l.bf16 %v239_v0  ;;  %v244_v3 = vunpack.c.h.bf16 %v239_v0  ;;  %v241_v4 = vunpack.c.l.bf16 %v238_v1  ;;  %v242_v5 = vunpack.c.h.bf16 %v238_v1  ;;  %v301_v24 = vld [vmem:[%s3450_s30 + $0x10] sm:$0x3]  ;;  %v212_v27 = vld [vmem:[%s3450_s30] sm:$0xff]  ;;  %s3282_s21 = smov 118  }
  0x55   : > { %v245_v13 = vunpack.c.l.bf16 %v240_v10  ;;  %v306_v28 = vunpack.c.l.bf16 %v301_v24  ;;  %v214_v32 = vunpack.c.l.bf16 %v212_v27  ;;  %v361_v33 = vld [vmem:[%s3450_s30 + $0x10] sm:$0x3]  ;;  %v1751_v34 = vld [vmem:[%s3450_s30 + $0x2] sm:$0xff]  ;;  %v215_v41 = vunpack.c.h.bf16 %v212_v27  ;;  %s3283_s24 = smov 117   ;;  %s3284_s27 = smov 34  }
  0x56   : > { %v253_v6 = vcombine.low %v243_v2, %v243_v2  ;;  %v251_v7 = vcombine.low %v241_v4, %v241_v4  ;;  %v254_v8 = vcombine.low %v244_v3, %v244_v3  ;;  %v252_v9 = vcombine.low %v242_v5, %v242_v5  ;;  %v213_v37 = vld [vmem:[%s3450_s30 + $0x8] sm:$0xff]  ;;  %s3285_s28 = smov 36   ;;  %s3286_s4 = smov 35  }
  0x57   : > { %v312_v16 = vcombine.high %v241_v4, %v241_v4  ;;  %v255_v17 = vcombine.low %v245_v13, %v245_v13  ;;  %v314_v19 = vcombine.high %v243_v2, %v243_v2  ;;  %v313_v20 = vcombine.high %v242_v5, %v242_v5  ;;  %230 = vst [vmem:[#allocation2 + $0x2b0] sm:$0xf] %v214_v32  ;;  %v3494_v52 = vld [vmem:[%s3450_s30 + $0xa] sm:$0xff]  ;;  %s3287_s5 = smov 45   ;;  %s3288_s6 = smov 44  }
  0x58   : > { %v3463_v11 = vpack.i.bf16 %v243_v2, %v253_v6  ;;  %v2605_v12 = vpack.i.bf16 %v241_v4, %v251_v7  ;;  %v3466_v14 = vpack.i.bf16 %v244_v3, %v254_v8  ;;  %v2610_v15 = vpack.i.bf16 %v242_v5, %v252_v9  ;;  %232 = vst [vmem:[#allocation2 + $0x10] sm:$0xf] %v215_v41  ;;  %s3289_s7 = smov 46   ;;  %s3290_s11 = smov 54  }
  0x59   : > { %v2625_v18 = vpack.i.bf16 %v312_v16, %v241_v4  ;;  %v3469_v21 = vpack.i.bf16 %v252_v9, %v241_v4  ;;  %v3471_v22 = vpack.i.bf16 %v314_v19, %v243_v2  ;;  %v2630_v23 = vpack.i.bf16 %v313_v20, %v242_v5  ;;  %s3291_s10 = smov 55   ;;  %s4529_s17 = smov 56  }
  0x5a   : > { %2616 = vrot.lane.b32.xlu1 %v3463_v11, %s3280_s18  ;;  %2606 = vrot.lane.b32.xlu0 %v2605_v12, %s3280_s18  ;;  %v315_v25 = vcombine.high %v244_v3, %v244_v3  ;;  %v3474_v26 = vpack.i.bf16 %v242_v5, %v251_v7  ;;  %v3477_v29 = vpack.i.bf16 %v242_v5, %v312_v16  ;;  %v366_v35 = vunpack.c.l.bf16 %v361_v33  ;;  %s4531_s22 = smov 6   ;;  %s3294_s25 = smov 7  }
  0x5b   : > { %v3482_v31 = vpack.i.bf16 %v313_v20, %v241_v4  ;;  %v1754_v36 = vunpack.c.l.bf16 %v1751_v34  ;;  %v222_v38 = vcombine.high %v214_v32, %v214_v32  ;;  %v216_v42 = vunpack.c.l.bf16 %v213_v37  ;;  %s4535_s29 = smov 8   ;;  %p4591_p0 = scmp.ne.s32.totalorder %s4556_s9, 0 }
  0x5c   : > { %v3480_v30 = vpack.i.bf16 %v315_v25, %v244_v3  ;;  %v376_v39 = vcombine.low %v366_v35, %v366_v35  ;;  %v217_v43 = vunpack.c.h.bf16 %v213_v37  ;;  %v1755_v44 = vunpack.c.h.bf16 %v1751_v34 }
  0x5d   : > { %v1764_v40 = vcombine.high %v1754_v36, %v1754_v36  ;;  %231 = vst [vmem:[#allocation2 + $0xd0] sm:$0xf] %v222_v38  ;;  %v223_v45 = vcombine.high %v215_v41, %v215_v41  ;;  %v224_v46 = vcombine.high %v216_v42, %v216_v42  ;;  %234 = vst [vmem:[#allocation2 + $0x360] sm:$0xf] %v216_v42  ;;  %v1756_v55 = vunpack.c.l.bf16 %v3494_v52 }
  0x5e   : > { %2621 = vrot.lane.b32.xlu1 %v3466_v14, %s3280_s18  ;;  %2611 = vrot.lane.b32.xlu0 %v2610_v15, %s3280_s18  ;;  %v225_v47 = vcombine.high %v217_v43, %v217_v43  ;;  %236 = vst [vmem:[#allocation2 + $0x40] sm:$0xf] %v217_v43  ;;  %v1765_v49 = vcombine.high %v1755_v44, %v1755_v44  ;;  %vm274_vm0 = vcmask 1039360   ;;  %vm334_vm1 = vcmask 1031168  }
  0x5f   : > { %233 = vst [vmem:[#allocation2 + $0x48] sm:$0xf] %v223_v45  ;;  %235 = vst [vmem:[#allocation2 + $0x328] sm:$0xf] %v224_v46  ;;  %v2675_v48 = vpack.i.bf16 %v1755_v44, %v1764_v40  ;;  %v1704_v51 = vcombine.low %v1755_v44, %v1755_v44  ;;  %v1703_v54 = vcombine.low %v1754_v36, %v1754_v36  ;;  %vm395_vm2 = vcmask 965632  }
  0x60   : > { %237 = vst [vmem:[#allocation2 + $0x378] sm:$0xf] %v225_v47  ;;  %v2680_v50 = vpack.i.bf16 %v1765_v49, %v1754_v36  ;;  %v1766_v57 = vcombine.high %v1756_v55, %v1756_v55  ;;  %v1705_v59 = vcombine.low %v1756_v55, %v1756_v55  ;;  %vm455_vm3 = vcmask 957440  }
  0x61   : > { %v2690_v53 = vpack.i.bf16 %v1704_v51, %v1754_v36  ;;  %v2700_v56 = vpack.i.bf16 %v1755_v44, %v1703_v54  ;;  %vm1786_vm4 = vcmask 277504   ;;  %vm1665_vm5 = vcmask 293888  }
  0x62   : > { %2626 = vrot.lane.b32.xlu1 %v2625_v18, %s3281_s20  ;;  %272 = vrot.lane.b32.xlu0 %v255_v17, %s3280_s18  ;;  %v2715_v58 = vpack.i.bf16 %v1766_v57, %v1756_v55  ;;  %v2745_v60 = vpack.i.bf16 %v1756_v55, %v1705_v59  ;;  %s4533_s18 = smov 16   ;;  %vm1726_vm6 = vcmask 285696   ;;  %vm1928_vm7 = vcmask 1043456  }
  0x63   : > { %vm1544_vm8 = vcmask 367616   ;;  %vm1605_vm9 = vcmask 359424   ;;  %vm1484_vm10 = vcmask 375808   ;;  %vm1423_vm11 = vcmask 441344  }
  0x64   : > { %vm1363_vm12 = vcmask 449536   ;;  %vm4543_vm13 = vcmask 457728   ;;  %vm4545_vm14 = vcmask 48128   ;;  %vm4544_vm15 = vcmask 56320  }
  0x66   : > { %2636 = vrot.lane.b32.xlu1 %v3471_v22, %s3281_s20  ;;  %2631 = vrot.lane.b32.xlu0 %v2630_v23, %s3281_s20 }
  0x6a   : > { %332 = vrot.lane.b32.xlu1 %v306_v28, %s3281_s20  ;;  %2641 = vrot.lane.b32.xlu0 %v3480_v30, %s3281_s20  ;;  %s4539_s20 = smov 17  }
  0x6e   : > { %2651 = vrot.lane.b32.xlu1 %v2610_v15, %s3282_s21  ;;  %2646 = vrot.lane.b32.xlu0 %v2605_v12, %s3282_s21 }
  0x72   : > { %2661 = vrot.lane.b32.xlu1 %v3466_v14, %s3282_s21  ;;  %2656 = vrot.lane.b32.xlu0 %v3463_v11, %s3282_s21 }
  0x76   : > { %2666 = vrot.lane.b32.xlu1 %v2625_v18, %s3283_s24  ;;  %393 = vrot.lane.b32.xlu0 %v376_v39, %s3282_s21  ;;  %s4537_s21 = smov 18  }
  0x7a   : > { %2676 = vrot.lane.b32.xlu1 %v2675_v48, %s3284_s27  ;;  %2671 = vrot.lane.b32.xlu0 %v2630_v23, %s3283_s24 }
  0x7e   : > { %2686 = vrot.lane.b32.xlu1 %v2675_v48, %s3285_s28  ;;  %2681 = vrot.lane.b32.xlu0 %v2680_v50, %s3284_s27 }
  0x82   : > { %2696 = vrot.lane.b32.xlu1 %v2680_v50, %s3285_s28  ;;  %2691 = vrot.lane.b32.xlu0 %v2690_v53, %s3286_s4 }
  0x86   : > { %2706 = vrot.lane.b32.xlu1 %v2675_v48, %s3287_s5  ;;  %2701 = vrot.lane.b32.xlu0 %v2700_v56, %s3286_s4 }
  0x8a   : > { %2716 = vrot.lane.b32.xlu1 %v2715_v58, %s3284_s27  ;;  %2711 = vrot.lane.b32.xlu0 %v2690_v53, %s3288_s6 }
  0x8e   : > { %2726 = vrot.lane.b32.xlu1 %v2700_v56, %s3288_s6  ;;  %2721 = vrot.lane.b32.xlu0 %v2680_v50, %s3287_s5 }
  0x92   : > { %2736 = vrot.lane.b32.xlu1 %v2690_v53, %s3289_s7  ;;  %2731 = vrot.lane.b32.xlu0 %v2675_v48, %s3290_s11 }
  0x96   : > { %2746 = vrot.lane.b32.xlu1 %v2745_v60, %s3286_s4  ;;  %2741 = vrot.lane.b32.xlu0 %v2715_v58, %s3285_s28 }
  0x9a   : > { %2756 = vrot.lane.b32.xlu1 %v2700_v56, %s3289_s7  ;;  %2751 = vrot.lane.b32.xlu0 %v2680_v50, %s3290_s11 }
  0x9e   : > { %2766 = vrot.lane.b32.xlu1 %v2690_v53, %s3291_s10  ;;  %2761 = vrot.lane.b32.xlu0 %v2675_v48, %s4529_s17 }
  0xa2   : > { %2776 = vrot.lane.b32.xlu1 %v2745_v60, %s3288_s6  ;;  %2771 = vrot.lane.b32.xlu0 %v2715_v58, %s3287_s5 }
  0xa6   : > { %2786 = vrot.lane.b32.xlu1 %v2700_v56, %s3291_s10  ;;  %2781 = vrot.lane.b32.xlu0 %v2680_v50, %s4529_s17 }
  0xaa   : > { %2796 = vrot.lane.b32.xlu1 %v3469_v21, %s4531_s22  ;;  %2791 = vrot.lane.b32.xlu0 %v3477_v29, %s3294_s25 }
  0xae   : > { %2806 = vrot.lane.b32.xlu1 %v2745_v60, %s3289_s7  ;;  %2801 = vrot.lane.b32.xlu0 %v2715_v58, %s3290_s11 }
  0xb2   : > { %2816 = vrot.lane.b32.xlu1 %v3474_v26, %s4531_s22  ;;  %2811 = vrot.lane.b32.xlu0 %v3482_v31, %s3294_s25 }
  0xb6   : > { %2826 = vrot.lane.b32.xlu1 %v3469_v21, %s4535_s29  ;;  %2821 = vrot.lane.b32.xlu0 %v3477_v29, %s4533_s18 }
  0xba   : > { %2836 = vrot.lane.b32.xlu1 %v2745_v60, %s3291_s10  ;;  %2831 = vrot.lane.b32.xlu0 %v2715_v58, %s4529_s17  ;;  %s3299_s17 = smov 26  }
  0xbe   : > { %2846 = vrot.lane.b32.xlu1 %v3474_v26, %s4535_s29  ;;  %2841 = vrot.lane.b32.xlu0 %v3482_v31, %s4533_s18 }
  0xc2   : > { %2856 = vrot.lane.b32.xlu1 %v3469_v21, %s4539_s20  ;;  %2851 = vrot.lane.b32.xlu0 %v3477_v29, %s4537_s21 }
  0xc6   : > { %2866 = vrot.lane.b32.xlu1 %v3463_v11, %s4531_s22  ;;  %2861 = vrot.lane.b32.xlu0 %v3471_v22, %s3294_s25  ;;  %s4541_s22 = smov 27  }
  0xca   : > { %2876 = vrot.lane.b32.xlu1 %v3474_v26, %s4539_s20  ;;  %2871 = vrot.lane.b32.xlu0 %v3482_v31, %s4537_s21 }
  0xcc   : > { %v2617_v61 = vpop.permute.xlu1 %2616  ;;  %v2607_v62 = vpop.permute.xlu0 %2606 }
  0xcd   : > { %v2619_v63 = vunpack.i.h.bf16 %v2617_v61  ;;  %v2618_v0 = vunpack.i.l.bf16 %v2617_v61  ;;  %v2609_v1 = vunpack.i.h.bf16 %v2607_v62  ;;  %v2608_v2 = vunpack.i.l.bf16 %v2607_v62 }
  0xce   : > { %2886 = vrot.lane.b32.xlu1 %v3469_v21, %s3299_s17  ;;  %2881 = vrot.lane.b32.xlu0 %v3477_v29, %s4541_s22 }
  0xcf   : > { %v279_v3 = vsel %vm274_vm0, %v2618_v0, %v2619_v63  ;;  %v275_v4 = vsel %vm274_vm0, %v2608_v2, %v2609_v1 }
  0xd0   : > { %295 = vst [vmem:[#allocation2 + $0x360] sm:$0xf0] %v279_v3  ;;  %291 = vst [vmem:[#allocation2 + $0x2b0] sm:$0xf0] %v275_v4  ;;  %v2622_v5 = vpop.permute.xlu1 %2621  ;;  %v2612_v6 = vpop.permute.xlu0 %2611  ;;  %v3603_v3 = vld [vmem:[%s3450_s30 + $0x8] sm:$0xff] }
  0xd1   : > { %v2624_v7 = vunpack.i.h.bf16 %v2622_v5  ;;  %v2623_v8 = vunpack.i.l.bf16 %v2622_v5  ;;  %v2614_v9 = vunpack.i.h.bf16 %v2612_v6  ;;  %v2613_v10 = vunpack.i.l.bf16 %v2612_v6 }
  0xd2   : > { %2896 = vrot.lane.b32.xlu1 %v3463_v11, %s4535_s29  ;;  %2891 = vrot.lane.b32.xlu0 %v3471_v22, %s4533_s18  ;;  %s3301_s18 = smov 28   ;;  %s3302_s29 = smov 106  }
  0xd3   : > { %v280_v12 = vsel %vm274_vm0, %v2619_v63, %v2623_v8  ;;  %v281_v13 = vsel %vm274_vm0, %v2623_v8, %v2624_v7  ;;  %v278_v15 = vsel %vm274_vm0, %v2614_v9, %v2618_v0  ;;  %v276_v16 = vsel %vm274_vm0, %v2609_v1, %v2613_v10 }
  0xd4   : > { %296 = vst [vmem:[#allocation2 + $0x328] sm:$0xf0] %v280_v12  ;;  %297 = vst [vmem:[#allocation2 + $0x40] sm:$0xf0] %v281_v13  ;;  %v277_v17 = vsel %vm274_vm0, %v2613_v10, %v2614_v9  ;;  %v2627_v18 = vpop.permute.xlu1 %2626  ;;  %v273_v19 = vpop.permute.xlu0 %272  ;;  %v3611_v8 = vunpack.c.l.bf16 %v3603_v3 }
  0xd5   : > { %294 = vst [vmem:[#allocation2 + $0x48] sm:$0xf0] %v278_v15  ;;  %292 = vst [vmem:[#allocation2 + $0xd0] sm:$0xf0] %v276_v16  ;;  %v2629_v20 = vunpack.i.h.bf16 %v2627_v18  ;;  %v2628_v23 = vunpack.i.l.bf16 %v2627_v18  ;;  %v282_v24 = vsel %vm274_vm0, %v2624_v7, %v273_v19  ;;  %vm4547_vm0 = vcmask 64512  }
  0xd6   : > { %293 = vst [vmem:[#allocation2 + $0x10] sm:$0xf0] %v277_v17  ;;  %298 = vst [vmem:[#allocation2 + $0x378] sm:$0xf0] %v282_v24  ;;  %2906 = vrot.lane.b32.xlu1 %v3474_v26, %s3299_s17  ;;  %2901 = vrot.lane.b32.xlu0 %v3482_v31, %s4541_s22 }
  0xd7   : > { %v335_v25 = vsel %vm334_vm1, %v2628_v23, %v2629_v20 }
  0xd8   : > { %351 = vst [vmem:[#allocation2 + $0x108] sm:$0xf] %v335_v25  ;;  %v2637_v27 = vpop.permute.xlu1 %2636  ;;  %v2632_v28 = vpop.permute.xlu0 %2631 }
  0xd9   : > { %v2639_v32 = vunpack.i.h.bf16 %v2637_v27  ;;  %v2638_v33 = vunpack.i.l.bf16 %v2637_v27  ;;  %v2634_v34 = vunpack.i.h.bf16 %v2632_v28  ;;  %v2633_v35 = vunpack.i.l.bf16 %v2632_v28 }
  0xda   : > { %2916 = vrot.lane.b32.xlu1 %v3469_v21, %s3301_s18  ;;  %2911 = vrot.lane.b32.xlu0 %v3477_v29, %s3302_s29 }
  0xdb   : > { %v339_v36 = vsel %vm334_vm1, %v2638_v33, %v2639_v32  ;;  %v338_v37 = vsel %vm334_vm1, %v2634_v34, %v2638_v33  ;;  %v336_v38 = vsel %vm334_vm1, %v2629_v20, %v2633_v35  ;;  %v337_v39 = vsel %vm334_vm1, %v2633_v35, %v2634_v34 }
  0xdc   : > { %355 = vst [vmem:[#allocation2 + $0x148] sm:$0xf] %v339_v36  ;;  %354 = vst [vmem:[#allocation2 + $0x318] sm:$0xf] %v338_v37  ;;  %v333_v40 = vpop.permute.xlu1 %332  ;;  %v2642_v41 = vpop.permute.xlu0 %2641  ;;  %v556_v33 = vcombine.high %v3611_v8, %v3611_v8 }
  0xdd   : > { %352 = vst [vmem:[#allocation2 + $0x110] sm:$0xf] %v336_v38  ;;  %353 = vst [vmem:[#allocation2 + $0x90] sm:$0xf] %v337_v39  ;;  %v2644_v42 = vunpack.i.h.bf16 %v2642_v41  ;;  %v2643_v43 = vunpack.i.l.bf16 %v2642_v41 }
  0xde   : > { %2926 = vrot.lane.b32.xlu1 %v3463_v11, %s4539_s20  ;;  %2921 = vrot.lane.b32.xlu0 %v3471_v22, %s4537_s21  ;;  %s3303_s21 = smov 107   ;;  %s3304_s20 = smov 108   ;;  %v2990_v41 = vpack.i.bf16 %v556_v33, %v3611_v8 }
  0xdf   : > { %v342_v44 = vsel %vm334_vm1, %v2644_v42, %v333_v40  ;;  %v340_v45 = vsel %vm334_vm1, %v2639_v32, %v2643_v43  ;;  %v341_v46 = vsel %vm334_vm1, %v2643_v43, %v2644_v42  ;;  %v1636_v42 = vunpack.c.h.bf16 %v3494_v52 }
  0xe0   : > { %358 = vst [vmem:[#allocation2 + $0x2d8] sm:$0xf] %v342_v44  ;;  %356 = vst [vmem:[#allocation2 + $0x100] sm:$0xf] %v340_v45  ;;  %v2652_v47 = vpop.permute.xlu1 %2651  ;;  %v2647_v48 = vpop.permute.xlu0 %2646  ;;  %vm4546_vm1 = vcmask 130048  }
  0xe1   : > { %357 = vst [vmem:[#allocation2 + $0x58] sm:$0xf] %v341_v46  ;;  %v2654_v49 = vunpack.i.h.bf16 %v2652_v47  ;;  %v2653_v50 = vunpack.i.l.bf16 %v2652_v47  ;;  %v2649_v51 = vunpack.i.h.bf16 %v2647_v48  ;;  %v2648_v53 = vunpack.i.l.bf16 %v2647_v48 }
  0xe2   : > { %2936 = vrot.lane.b32.xlu1 %v3474_v26, %s3301_s18  ;;  %2931 = vrot.lane.b32.xlu0 %v3482_v31, %s3302_s29 }
  0xe3   : > { %v398_v54 = vsel %vm395_vm2, %v2653_v50, %v2654_v49  ;;  %v397_v55 = vsel %vm395_vm2, %v2649_v51, %v2653_v50  ;;  %v396_v56 = vsel %vm395_vm2, %v2648_v53, %v2649_v51  ;;  %v1646_v51 = vcombine.high %v1636_v42, %v1636_v42 }
  0xe4   : > { %414 = vst [vmem:[#allocation2 + $0x90] sm:$0xf0] %v398_v54  ;;  %413 = vst [vmem:[#allocation2 + $0x110] sm:$0xf0] %v397_v55  ;;  %v2662_v57 = vpop.permute.xlu1 %2661  ;;  %v2657_v58 = vpop.permute.xlu0 %2656 }
  0xe5   : > { %412 = vst [vmem:[#allocation2 + $0x108] sm:$0xf0] %v396_v56  ;;  %v2664_v59 = vunpack.i.h.bf16 %v2662_v57  ;;  %v2663_v60 = vunpack.i.l.bf16 %v2662_v57  ;;  %v2659_v61 = vunpack.i.h.bf16 %v2657_v58  ;;  %v2658_v62 = vunpack.i.l.bf16 %v2657_v58 }
  0xe6   : > { %2946 = vrot.lane.b32.xlu1 %v3469_v21, %s3303_s21  ;;  %2941 = vrot.lane.b32.xlu0 %v3477_v29, %s3304_s20 }
  0xe7   : > { %v402_v63 = vsel %vm395_vm2, %v2663_v60, %v2664_v59  ;;  %v401_v0 = vsel %vm395_vm2, %v2659_v61, %v2663_v60  ;;  %v399_v1 = vsel %vm395_vm2, %v2654_v49, %v2658_v62  ;;  %v400_v2 = vsel %vm395_vm2, %v2658_v62, %v2659_v61 }
  0xe8   : > { %418 = vst [vmem:[#allocation2 + $0x58] sm:$0xf0] %v402_v63  ;;  %417 = vst [vmem:[#allocation2 + $0x100] sm:$0xf0] %v401_v0  ;;  %v2667_v4 = vpop.permute.xlu1 %2666  ;;  %v394_v5 = vpop.permute.xlu0 %393  ;;  %v3682_v63 = vpack.i.bf16 %v1646_v51, %v1636_v42  ;;  %v1706_v0 = vcombine.low %v1636_v42, %v1636_v42 }
  0xe9   : > { %415 = vst [vmem:[#allocation2 + $0x318] sm:$0xf0] %v399_v1  ;;  %416 = vst [vmem:[#allocation2 + $0x148] sm:$0xf0] %v400_v2  ;;  %v2669_v6 = vunpack.i.h.bf16 %v2667_v4  ;;  %v2668_v7 = vunpack.i.l.bf16 %v2667_v4  ;;  %v403_v29 = vsel %vm395_vm2, %v2664_v59, %v394_v5  ;;  %vm4549_vm2 = vcmask 138240  }
  0xea   : > { %419 = vst [vmem:[#allocation2 + $0x2d8] sm:$0xf0] %v403_v29  ;;  %2956 = vrot.lane.b32.xlu1 %v3463_v11, %s3299_s17  ;;  %2951 = vrot.lane.b32.xlu0 %v3471_v22, %s4541_s22  ;;  %v3624_v11 = vcombine.low %v3611_v8, %v3611_v8  ;;  %s3305_s22 = smov 116   ;;  %v3306_v29 = vmov 0.0  }
  0xeb   : > { %v456_v9 = vsel %vm455_vm3, %v2668_v7, %v2669_v6  ;;  %2017 = vmatprep.mubr.f32.mxu0 %v3306_v29  ;;  %2088 = vmatprep.mubr.f32.mxu1 %v3306_v29 }
  0xec   : > { %472 = vst [vmem:[#allocation2 + $0x28] sm:$0xf] %v456_v9  ;;  %v2677_v10 = vpop.permute.xlu1 %2676  ;;  %v3614_v12 = vpop.permute.xlu0 %2671  ;;  %v2980_v32 = vpack.i.bf16 %v3611_v8, %v3624_v11 }
  0xed   : > { %v2679_v13 = vunpack.i.h.bf16 %v2677_v10  ;;  %v2678_v15 = vunpack.i.l.bf16 %v2677_v10  ;;  %v2674_v16 = vunpack.i.h.bf16 %v3614_v12  ;;  %v2673_v17 = vunpack.i.l.bf16 %v3614_v12 }
  0xee   : > { %2966 = vrot.lane.b32.xlu1 %v3474_v26, %s3303_s21  ;;  %2961 = vrot.lane.b32.xlu0 %v3482_v31, %s3304_s20 }
  0xef   : > { %v1788_v18 = vsel %vm1786_vm4, %v2678_v15, %v2679_v13  ;;  %v457_v19 = vsel %vm455_vm3, %v2669_v6, %v2673_v17  ;;  %v458_v20 = vsel %vm455_vm3, %v2673_v17, %v2674_v16  ;;  %v3705_v17 = vpack.i.bf16 %v1636_v42, %v1706_v0 }
  0xf0   : > { %1804 = vst [vmem:[#allocation2 + $0x220] sm:$0xf] %v1788_v18  ;;  %473 = vst [vmem:[#allocation2 + $0x330] sm:$0xf] %v457_v19  ;;  %v2687_v23 = vpop.permute.xlu1 %2686  ;;  %v3631_v24 = vpop.permute.xlu0 %2681 }
  0xf1   : > { %474 = vst [vmem:[#allocation2 + $0x2d0] sm:$0xf] %v458_v20  ;;  %v2689_v31 = vunpack.i.h.bf16 %v2687_v23  ;;  %v2688_v25 = vunpack.i.l.bf16 %v2687_v23  ;;  %v2684_v27 = vunpack.i.h.bf16 %v3631_v24  ;;  %v2683_v28 = vunpack.i.l.bf16 %v3631_v24  ;;  %v1753_v24 = vld [vmem:[%s3450_s30 + $0x12] sm:$0x3] }
  0xf2   : > { %2976 = vrot.lane.b32.xlu1 %v3471_v22, %s3302_s29  ;;  %2971 = vrot.lane.b32.xlu0 %v3469_v21, %s3305_s22 }
  0xf3   : > { %v1667_v34 = vsel %vm1665_vm5, %v2688_v25, %v2689_v31  ;;  %v1789_v35 = vsel %vm1786_vm4, %v2679_v13, %v2684_v27  ;;  %v1787_v36 = vsel %vm1786_vm4, %v2683_v28, %v2678_v15 }
  0xf4   : > { %1683 = vst [vmem:[#allocation2 + $0x258] sm:$0xf] %v1667_v34  ;;  %1805 = vst [vmem:[#allocation2 + $0x8] sm:$0xf] %v1789_v35  ;;  %v3648_v22 = vpop.permute.xlu1 %2696  ;;  %v2692_v21 = vpop.permute.xlu0 %2691  ;;  %v1758_v34 = vunpack.c.l.bf16 %v1753_v24 }
  0xf5   : > { %1803 = vst [vmem:[#allocation2 + $0x190] sm:$0xf] %v1787_v36  ;;  %v2699_v37 = vunpack.i.h.bf16 %v3648_v22  ;;  %v2698_v38 = vunpack.i.l.bf16 %v3648_v22  ;;  %v2694_v39 = vunpack.i.h.bf16 %v2692_v21  ;;  %v2693_v40 = vunpack.i.l.bf16 %v2692_v21 }
  0xf6   : > { %2986 = vrot.lane.b32.xlu1 %v3474_v26, %s3305_s22  ;;  %2981 = vrot.lane.b32.xlu0 %v2980_v32, %s3301_s18 }
  0xf7   : > { %v1666_v43 = vsel %vm1665_vm5, %v2698_v38, %v2688_v25  ;;  %v1668_v44 = vsel %vm1665_vm5, %v2689_v31, %v2699_v37  ;;  %v1728_v45 = vsel %vm1726_vm6, %v2693_v40, %v2694_v39  ;;  %v1918_v46 = vld [vmem:[#allocation2 + $0x220] sm:$0xf] }
  0xf8   : > { %1682 = vst [vmem:[#allocation2 + $0x240] sm:$0xf] %v1666_v43  ;;  %1684 = vst [vmem:[#allocation2 + $0x1b8] sm:$0xf] %v1668_v44  ;;  %v2707_v26 = vpop.permute.xlu1 %2706  ;;  %2490 = vmatprep.subr.msk.mxu0 %vm1928_vm7, %v1918_v46  ;;  %v3663_v47 = vpop.permute.xlu0 %2701 }
  0xf9   : > { %1744 = vst [vmem:[#allocation2 + $0x258] sm:$0xf0] %v1728_v45  ;;  %v2709_v48 = vunpack.i.h.bf16 %v2707_v26  ;;  %v2708_v52 = vunpack.i.l.bf16 %v2707_v26  ;;  %v2704_v49 = vunpack.i.h.bf16 %v3663_v47  ;;  %v2703_v50 = vunpack.i.l.bf16 %v3663_v47 }
  0xfa   : > { %2996 = vrot.lane.b32.xlu1 %v2980_v32, %s3303_s21  ;;  %2991 = vrot.lane.b32.xlu0 %v2990_v41, %s3304_s20 }
  0xfb   : > { %v1546_v53 = vsel %vm1544_vm8, %v2708_v52, %v2709_v48  ;;  %v1727_v54 = vsel %vm1726_vm6, %v2703_v50, %v2693_v40  ;;  %v1729_v55 = vsel %vm1726_vm6, %v2694_v39, %v2704_v49  ;;  %v1692_v39 = vld [vmem:[%s3450_s30 + $0x12] sm:$0x3]  ;;  %v1919_v42 = vld [vmem:[#allocation2 + $0x8] sm:$0xf] }
  0xfc   : > { %v1917_v56 = vld [vmem:[#allocation2 + $0x190] sm:$0xf]  ;;  %1562 = vst [vmem:[#allocation2 + $0x168] sm:$0xf] %v1546_v53  ;;  %1743 = vst [vmem:[#allocation2 + $0x240] sm:$0xf0] %v1727_v54  ;;  %v3674_v57 = vpop.permute.xlu1 %2716  ;;  %v2712_v58 = vpop.permute.xlu0 %2711  ;;  %v1697_v26 = vunpack.c.l.bf16 %v1692_v39 }
  0xfd   : > { %1745 = vst [vmem:[#allocation2 + $0x1b8] sm:$0xf0] %v1729_v55  ;;  %2491 = vmatpush1.msk.msra.mxu0 %vm1928_vm7, %v1917_v56  ;;  %v2719_v59 = vunpack.i.h.bf16 %v3674_v57  ;;  %v2718_v60 = vunpack.i.l.bf16 %v3674_v57  ;;  %v2714_v61 = vunpack.i.h.bf16 %v2712_v58  ;;  %v2713_v62 = vunpack.i.l.bf16 %v2712_v58  ;;  %v1632_v54 = vld [vmem:[%s3450_s30 + $0x12] sm:$0x3] }
  0xfe   : > { %506 = vrot.lane.b32.xlu1 %v3624_v11, %s3305_s22  ;;  %3001 = vrot.lane.b32.xlu0 %v2990_v41, %s3283_s24  ;;  %v1707_v58 = vcombine.low %v1697_v26, %v1697_v26 }
  0xff   : > { %v1790_v1 = vsel %vm1786_vm4, %v2684_v27, %v2718_v60  ;;  %v1791_v2 = vsel %vm1786_vm4, %v2718_v60, %v2719_v59  ;;  %v1607_v4 = vsel %vm1605_vm9, %v2713_v62, %v2714_v61  ;;  %v1637_v60 = vunpack.c.l.bf16 %v1632_v54 }
 0x100   : > { %v1910_v5 = vld [vmem:[#allocation2 + $0x258] sm:$0xff]  ;;  %1806 = vst [vmem:[#allocation2 + $0x18] sm:$0xf] %v1790_v1  ;;  %1807 = vst [vmem:[#allocation2] sm:$0xf] %v1791_v2  ;;  %v3691_v6 = vpop.permute.xlu1 %2726  ;;  %v3693_v7 = vpop.permute.xlu0 %2721 }
 0x101   : > { %1623 = vst [vmem:[#allocation2 + $0x168] sm:$0xf0] %v1607_v4  ;;  %1959 = vmatprep.subr.mxu0 %v1910_v5  ;;  %v2729_v9 = vunpack.i.h.bf16 %v3691_v6  ;;  %v2728_v10 = vunpack.i.l.bf16 %v3691_v6  ;;  %v2724_v13 = vunpack.i.h.bf16 %v3693_v7  ;;  %v2723_v15 = vunpack.i.l.bf16 %v3693_v7  ;;  %v1571_v4 = vld [vmem:[%s3450_s30 + $0x12] sm:$0x3] }
 0x102   : > { %3011 = vrot.lane.b32.xlu1 %v3682_v63, %s3285_s28  ;;  %3006 = vrot.lane.b32.xlu0 %v3682_v63, %s3284_s27 }
 0x103   : > { %v1606_v11 = vsel %vm1605_vm9, %v2728_v10, %v2713_v62  ;;  %v1608_v18 = vsel %vm1605_vm9, %v2714_v61, %v2729_v9  ;;  %v1547_v19 = vsel %vm1544_vm8, %v2709_v48, %v2724_v13  ;;  %v1545_v20 = vsel %vm1544_vm8, %v2723_v15, %v2708_v52  ;;  %v1909_v23 = vld [vmem:[#allocation2 + $0x240] sm:$0xff] }
 0x104   : > { %1622 = vst [vmem:[#allocation2 + $0x348] sm:$0xf0] %v1606_v11  ;;  %1624 = vst [vmem:[#allocation2 + $0x288] sm:$0xf0] %v1608_v18  ;;  %v2737_v31 = vpop.permute.xlu1 %2736  ;;  %v2732_v25 = vpop.permute.xlu0 %2731  ;;  %1960 = vmatpush1.msra.mxu0 %v1909_v23 }
 0x105   : > { %1563 = vst [vmem:[#allocation2 + $0x288] sm:$0xf] %v1547_v19  ;;  %1561 = vst [vmem:[#allocation2 + $0x348] sm:$0xf] %v1545_v20  ;;  %v2739_v27 = vunpack.i.h.bf16 %v2737_v31  ;;  %v2738_v28 = vunpack.i.l.bf16 %v2737_v31  ;;  %v2734_v32 = vunpack.i.h.bf16 %v2732_v25  ;;  %v2733_v33 = vunpack.i.l.bf16 %v2732_v25  ;;  %v1511_v25 = vld [vmem:[%s3450_s30 + $0x12] sm:$0x3] }
 0x106   : > { %3021 = vrot.lane.b32.xlu1 %v3682_v63, %s3287_s5  ;;  %3016 = vrot.lane.b32.xlu0 %v3705_v17, %s3286_s4  ;;  %v1576_v20 = vunpack.c.l.bf16 %v1571_v4 }
 0x107   : > { %v1486_v35 = vsel %vm1484_vm10, %v2738_v28, %v2739_v27  ;;  %v1425_v36 = vsel %vm1423_vm11, %v2733_v33, %v2734_v32  ;;  %v1920_v38 = vld [vmem:[#allocation2 + $0x18] sm:$0xf] }
 0x108   : > { %v1902_v21 = vld [vmem:[#allocation2 + $0x168] sm:$0xff]  ;;  %1502 = vst [vmem:[#allocation2 + $0x20] sm:$0xf0] %v1486_v35  ;;  %1441 = vst [vmem:[#allocation2 + $0x20] sm:$0xf] %v1425_v36  ;;  %v3723_v40 = vpop.permute.xlu1 %2746  ;;  %v3725_v41 = vpop.permute.xlu0 %2741  ;;  %2493 = vmatprep.subr.msk.mxu1 %vm1928_vm7, %v1920_v38  ;;  %v1516_v38 = vunpack.c.l.bf16 %v1511_v25 }
 0x109   : > { %1961 = vmatprep.subr.mxu0 %v1902_v21  ;;  %v2749_v43 = vunpack.i.h.bf16 %v3723_v40  ;;  %v2748_v44 = vunpack.i.l.bf16 %v3723_v40  ;;  %v2744_v45 = vunpack.i.h.bf16 %v3725_v41  ;;  %v2743_v46 = vunpack.i.l.bf16 %v3725_v41  ;;  %2494 = vmatpush1.msk.msra.mxu1 %vm1928_vm7, %v1919_v42 }
 0x10a   : > { %1784 = vrot.lane.b32.xlu1 %v1758_v34, %s3284_s27  ;;  %3026 = vrot.lane.b32.xlu0 %v3705_v17, %s3288_s6  ;;  %s4562_s27 = smov 56   ;;  %v1586_v21 = vcombine.low %v1576_v20, %v1576_v20 }
 0x10b   : > { %v1730_v48 = vsel %vm1726_vm6, %v2704_v49, %v2748_v44  ;;  %v1731_v52 = vsel %vm1726_vm6, %v2748_v44, %v2749_v43  ;;  %v1669_v50 = vsel %vm1665_vm5, %v2699_v37, %v2743_v46  ;;  %v1670_v51 = vsel %vm1665_vm5, %v2743_v46, %v2744_v45 }
 0x10c   : > { %v1901_v53 = vld [vmem:[#allocation2 + $0x348] sm:$0xff]  ;;  %1746 = vst [vmem:[#allocation2 + $0x118] sm:$0xf0] %v1730_v48  ;;  %1747 = vst [vmem:[#allocation2 + $0x88] sm:$0xf0] %v1731_v52  ;;  %v3749_v47 = vpop.permute.xlu1 %2756  ;;  %v3751_v49 = vpop.permute.xlu0 %2751 }
 0x10d   : > { %1685 = vst [vmem:[#allocation2 + $0x118] sm:$0xf] %v1669_v50  ;;  %1686 = vst [vmem:[#allocation2 + $0x88] sm:$0xf] %v1670_v51  ;;  %1962 = vmatpush1.msra.mxu0 %v1901_v53  ;;  %v2759_v22 = vunpack.i.h.bf16 %v3749_v47  ;;  %v2758_v37 = vunpack.i.l.bf16 %v3749_v47  ;;  %v2754_v55 = vunpack.i.h.bf16 %v3751_v49  ;;  %v2753_v56 = vunpack.i.l.bf16 %v3751_v49  ;;  %v1903_v20 = vld [vmem:[#allocation2 + $0x288] sm:$0xff] }
 0x10e   : > { %3036 = vrot.lane.b32.xlu1 %v3705_v17, %s3289_s7  ;;  %3031 = vrot.lane.b32.xlu0 %v3682_v63, %s3290_s11 }
 0x10f   : > { %v1485_v61 = vsel %vm1484_vm10, %v2758_v37, %v2738_v28  ;;  %v1487_v62 = vsel %vm1484_vm10, %v2739_v27, %v2759_v22  ;;  %v1424_v0 = vsel %vm1423_vm11, %v2753_v56, %v2733_v33  ;;  %v1426_v1 = vsel %vm1423_vm11, %v2734_v32, %v2754_v55  ;;  %v1894_v2 = vld [vmem:[#allocation2 + $0x20] sm:$0xff]  ;;  %v1911_v32 = vld [vmem:[#allocation2 + $0x1b8] sm:$0xff] }
 0x110   : > { %1501 = vst [vmem:[#allocation2 + $0x140] sm:$0xf0] %v1485_v61  ;;  %1503 = vst [vmem:[#allocation2 + $0x68] sm:$0xf0] %v1487_v62  ;;  %v2767_v5 = vpop.permute.xlu1 %2766  ;;  %v2762_v10 = vpop.permute.xlu0 %2761  ;;  %1963 = vmatprep.subr.mxu0 %v1894_v2  ;;  %v1390_v56 = vld [vmem:[%s3450_s30 + $0x12] sm:$0x3] }
 0x111   : > { %1440 = vst [vmem:[#allocation2 + $0x140] sm:$0xf] %v1424_v0  ;;  %1442 = vst [vmem:[#allocation2 + $0x68] sm:$0xf] %v1426_v1  ;;  %v2769_v15 = vunpack.i.h.bf16 %v2767_v5  ;;  %v2768_v11 = vunpack.i.l.bf16 %v2767_v5  ;;  %v2764_v18 = vunpack.i.h.bf16 %v2762_v10  ;;  %v2763_v19 = vunpack.i.l.bf16 %v2762_v10 }
 0x112   : > { %1724 = vrot.lane.b32.xlu1 %v1707_v58, %s3286_s4  ;;  %1663 = vrot.lane.b32.xlu0 %v1637_v60, %s3285_s28  ;;  %s4563_s28 = smov 6   ;;  %v1395_v4 = vunpack.c.l.bf16 %v1390_v56  ;;  %s4564_s4 = smov 8  }
 0x113   : > { %v1365_v23 = vsel %vm1363_vm12, %v2768_v11, %v2769_v15  ;;  %v1304_v24 = vsel %vm4543_vm13, %v2763_v19, %v2764_v18 }
 0x114   : > { %v1912_v31 = vld [vmem:[#allocation2 + $0x118] sm:$0xff]  ;;  %1381 = vst [vmem:[#allocation2 + $0x210] sm:$0xf0] %v1365_v23  ;;  %1320 = vst [vmem:[#allocation2 + $0x210] sm:$0xf] %v1304_v24  ;;  %v3775_v27 = vpop.permute.xlu1 %2776  ;;  %v3777_v28 = vpop.permute.xlu0 %2771 }
 0x115   : > { %2030 = vmatprep.subr.mxu1 %v1912_v31  ;;  %v2779_v33 = vunpack.i.h.bf16 %v3775_v27  ;;  %v2778_v34 = vunpack.i.l.bf16 %v3775_v27  ;;  %v2774_v35 = vunpack.i.h.bf16 %v3777_v28  ;;  %v2773_v36 = vunpack.i.l.bf16 %v3777_v28  ;;  %v1921_v27 = vld [vmem:[#allocation2] sm:$0xf] }
 0x116   : > { %2031 = vmatpush1.msra.mxu1 %v1911_v32  ;;  %3046 = vrot.lane.b32.xlu1 %v3705_v17, %s3291_s10 }
 0x117   : > { %3041 = vrot.lane.b32.xlu0 %v3682_v63, %s4562_s27  ;;  %v1609_v39 = vsel %vm1605_vm9, %v2729_v9, %v2778_v34  ;;  %v1610_v42 = vsel %vm1605_vm9, %v2778_v34, %v2779_v33  ;;  %v1548_v44 = vsel %vm1544_vm8, %v2724_v13, %v2773_v36  ;;  %v1549_v17 = vsel %vm1544_vm8, %v2773_v36, %v2774_v35  ;;  %v1450_v63 = vld [vmem:[%s3450_s30 + $0x12] sm:$0x3] }
 0x118   : > { %v1893_v46 = vld [vmem:[#allocation2 + $0x140] sm:$0xff]  ;;  %1625 = vst [vmem:[#allocation2 + $0x1d0] sm:$0xf0] %v1609_v39  ;;  %1626 = vst [vmem:[#allocation2 + $0x280] sm:$0xf0] %v1610_v42  ;;  %v3800_v6 = vpop.permute.xlu1 %2786  ;;  %v3802_v9 = vpop.permute.xlu0 %2781  ;;  %v1455_v52 = vunpack.c.l.bf16 %v1450_v63 }
 0x119   : > { %1564 = vst [vmem:[#allocation2 + $0x1d0] sm:$0xf] %v1548_v44  ;;  %1565 = vst [vmem:[#allocation2 + $0x280] sm:$0xf] %v1549_v17  ;;  %1964 = vmatpush1.msra.mxu0 %v1893_v46  ;;  %v2789_v7 = vunpack.i.h.bf16 %v3800_v6  ;;  %v2788_v13 = vunpack.i.l.bf16 %v3800_v6  ;;  %v2784_v26 = vunpack.i.h.bf16 %v3802_v9  ;;  %v2783_v48 = vunpack.i.l.bf16 %v3802_v9  ;;  %v1269_v42 = vld [vmem:[%s3450_s30 + $0x12] sm:$0x3] }
 0x11a   : > { %1603 = vrot.lane.b32.xlu1 %v1586_v21, %s3288_s6  ;;  %v1465_v2 = vcombine.low %v1455_v52, %v1455_v52  ;;  %v1274_v63 = vunpack.c.l.bf16 %v1269_v42  ;;  %s4566_s6 = smov 17  }
 0x11b   : > { %1542 = vrot.lane.b32.xlu0 %v1516_v38, %s3287_s5  ;;  %v1364_v50 = vsel %vm1363_vm12, %v2788_v13, %v2768_v11  ;;  %v1366_v51 = vsel %vm1363_vm12, %v2769_v15, %v2789_v7  ;;  %v1303_v53 = vsel %vm4543_vm13, %v2783_v48, %v2763_v19  ;;  %v1305_v54 = vsel %vm4543_vm13, %v2764_v18, %v2784_v26  ;;  %v1886_v37 = vld [vmem:[#allocation2 + $0x210] sm:$0xff]  ;;  %s4565_s5 = smov 16  }
 0x11c   : > { %1380 = vst [vmem:[#allocation2 + $0x30] sm:$0xf0] %v1364_v50  ;;  %1382 = vst [vmem:[#allocation2 + $0x1e0] sm:$0xf0] %v1366_v51  ;;  %v2797_v58 = vpop.permute.xlu1 %2796  ;;  %v2792_v60 = vpop.permute.xlu0 %2791  ;;  %1965 = vmatprep.subr.mxu0 %v1886_v37  ;;  %v1329_v11 = vld [vmem:[%s3450_s30 + $0x12] sm:$0x3] }
 0x11d   : > { %1319 = vst [vmem:[#allocation2 + $0x30] sm:$0xf] %v1303_v53  ;;  %1321 = vst [vmem:[#allocation2 + $0x1e0] sm:$0xf] %v1305_v54  ;;  %v2799_v61 = vunpack.i.h.bf16 %v2797_v58  ;;  %v2798_v62 = vunpack.i.l.bf16 %v2797_v58  ;;  %v2794_v0 = vunpack.i.h.bf16 %v2792_v60  ;;  %v2793_v1 = vunpack.i.l.bf16 %v2792_v60  ;;  %v1208_v53 = vld [vmem:[%s3450_s30 + $0x10] sm:$0x3] }
 0x11e   : > { %3056 = vrot.lane.b32.xlu1 %v3466_v14, %s4563_s28  ;;  %v1334_v32 = vunpack.c.l.bf16 %v1329_v11 }
 0x11f   : > { %3051 = vrot.lane.b32.xlu0 %v3480_v30, %s3294_s25  ;;  %v1244_v5 = vsel %vm4545_vm14, %v2798_v62, %v2799_v61  ;;  %v1183_v10 = vsel %vm4544_vm15, %v2793_v1, %v2794_v0 }
 0x120   : > { %v1904_v15 = vld [vmem:[#allocation2 + $0x1d0] sm:$0xff]  ;;  %1260 = vst [vmem:[#allocation2 + $0x370] sm:$0xf0] %v1244_v5  ;;  %1199 = vst [vmem:[#allocation2 + $0x370] sm:$0xf] %v1183_v10  ;;  %v3826_v18 = vpop.permute.xlu1 %2806  ;;  %v3828_v19 = vpop.permute.xlu0 %2801  ;;  %v1344_v46 = vcombine.low %v1334_v32, %v1334_v32 }
 0x121   : > { %2032 = vmatprep.subr.mxu1 %v1904_v15  ;;  %v2809_v23 = vunpack.i.h.bf16 %v3826_v18  ;;  %v2808_v24 = vunpack.i.l.bf16 %v3826_v18  ;;  %v2804_v31 = vunpack.i.h.bf16 %v3828_v19  ;;  %v2803_v25 = vunpack.i.l.bf16 %v3828_v19  ;;  %v1895_v15 = vld [vmem:[#allocation2 + $0x68] sm:$0xff] }
 0x122   : > { %2033 = vmatpush1.msra.mxu1 %v1903_v20  ;;  %1482 = vrot.lane.b32.xlu1 %v1465_v2, %s3289_s7  ;;  %s4567_s7 = smov 18  }
 0x123   : > { %1421 = vrot.lane.b32.xlu0 %v1395_v4, %s3290_s11  ;;  %v1488_v34 = vsel %vm1484_vm10, %v2759_v22, %v2808_v24  ;;  %v1489_v36 = vsel %vm1484_vm10, %v2808_v24, %v2809_v23  ;;  %v1427_v21 = vsel %vm1423_vm11, %v2754_v55, %v2803_v25  ;;  %v1428_v38 = vsel %vm1423_vm11, %v2803_v25, %v2804_v31  ;;  %v1148_v4 = vld [vmem:[%s3450_s30 + $0x10] sm:$0x3]  ;;  %s4568_s11 = smov 27  }
 0x124   : > { %v1885_v39 = vld [vmem:[#allocation2 + $0x30] sm:$0xff]  ;;  %1504 = vst [vmem:[#allocation2 + $0x78] sm:$0xf0] %v1488_v34  ;;  %1505 = vst [vmem:[#allocation2 + $0x188] sm:$0xf0] %v1489_v36  ;;  %v3849_v47 = vpop.permute.xlu1 %2816  ;;  %v3851_v22 = vpop.permute.xlu0 %2811  ;;  %v1153_v34 = vunpack.c.l.bf16 %v1148_v4 }
 0x125   : > { %1443 = vst [vmem:[#allocation2 + $0x78] sm:$0xf] %v1427_v21  ;;  %1444 = vst [vmem:[#allocation2 + $0x188] sm:$0xf] %v1428_v38  ;;  %1966 = vmatpush1.msra.mxu0 %v1885_v39  ;;  %v2819_v49 = vunpack.i.h.bf16 %v3849_v47  ;;  %v2818_v55 = vunpack.i.l.bf16 %v3849_v47  ;;  %v2814_v44 = vunpack.i.h.bf16 %v3851_v22  ;;  %v2813_v17 = vunpack.i.l.bf16 %v3851_v22 }
 0x126   : > { %3066 = vrot.lane.b32.xlu1 %v3466_v14, %s4564_s4 }
 0x127   : > { %3061 = vrot.lane.b32.xlu0 %v3480_v30, %s4565_s5  ;;  %v1243_v13 = vsel %vm4545_vm14, %v2818_v55, %v2798_v62  ;;  %v1245_v48 = vsel %vm4545_vm14, %v2799_v61, %v2819_v49  ;;  %v1182_v52 = vsel %vm4544_vm15, %v2813_v17, %v2793_v1  ;;  %v1184_v50 = vsel %vm4544_vm15, %v2794_v0, %v2814_v44  ;;  %v1878_v51 = vld [vmem:[#allocation2 + $0x370] sm:$0xff] }
 0x128   : > { %1259 = vst [vmem:[#allocation2 + $0x218] sm:$0xf0] %v1243_v13  ;;  %1261 = vst [vmem:[#allocation2 + $0xa8] sm:$0xf0] %v1245_v48  ;;  %v2827_v54 = vpop.permute.xlu1 %2826  ;;  %v2822_v37 = vpop.permute.xlu0 %2821  ;;  %1967 = vmatprep.subr.mxu0 %v1878_v51  ;;  %v1213_v62 = vunpack.c.l.bf16 %v1208_v53  ;;  %v1087_v55 = vld [vmem:[%s3450_s30 + $0x10] sm:$0x3] }
 0x129   : > { %1198 = vst [vmem:[#allocation2 + $0x218] sm:$0xf] %v1182_v52  ;;  %1200 = vst [vmem:[#allocation2 + $0xa8] sm:$0xf] %v1184_v50  ;;  %v2829_v56 = vunpack.i.h.bf16 %v2827_v54  ;;  %v2828_v58 = vunpack.i.l.bf16 %v2827_v54  ;;  %v2824_v60 = vunpack.i.h.bf16 %v2822_v37  ;;  %v2823_v61 = vunpack.i.l.bf16 %v2822_v37 }
 0x12a   : > { %1361 = vrot.lane.b32.xlu1 %v1344_v46, %s3291_s10  ;;  %v1223_v32 = vcombine.low %v1213_v62, %v1213_v62  ;;  %v1092_v13 = vunpack.c.l.bf16 %v1087_v55 }
 0x12b   : > { %1300 = vrot.lane.b32.xlu0 %v1274_v63, %s4562_s27  ;;  %v1123_v0 = vsel %vm4547_vm0, %v2828_v58, %v2829_v56  ;;  %v1062_v1 = vsel %vm4546_vm1, %v2823_v61, %v2824_v60  ;;  %v3909_v63 = vunpack.c.h.bf16 %v3603_v3  ;;  %v1027_v3 = vld [vmem:[%s3450_s30 + $0x10] sm:$0x3] }
 0x12c   : > { %v1896_v2 = vld [vmem:[#allocation2 + $0x78] sm:$0xff]  ;;  %1139 = vst [vmem:[#allocation2 + $0xf8] sm:$0xf0] %v1123_v0  ;;  %1078 = vst [vmem:[#allocation2 + $0xf8] sm:$0xf] %v1062_v1  ;;  %v3875_v5 = vpop.permute.xlu1 %2836  ;;  %v3877_v10 = vpop.permute.xlu0 %2831  ;;  %v1032_v0 = vunpack.c.l.bf16 %v1027_v3 }
 0x12d   : > { %2034 = vmatprep.subr.mxu1 %v1896_v2  ;;  %v2839_v11 = vunpack.i.h.bf16 %v3875_v5  ;;  %v2838_v20 = vunpack.i.l.bf16 %v3875_v5  ;;  %v2834_v24 = vunpack.i.h.bf16 %v3877_v10  ;;  %v2833_v25 = vunpack.i.l.bf16 %v3877_v10 }
 0x12e   : > { %2035 = vmatpush1.msra.mxu1 %v1895_v15  ;;  %3076 = vrot.lane.b32.xlu1 %v3466_v14, %s4566_s6  ;;  %v3928_v1 = vcombine.low %v3909_v63, %v3909_v63 }
 0x12f   : > { %3071 = vrot.lane.b32.xlu0 %v3480_v30, %s4567_s7  ;;  %v1367_v36 = vsel %vm1363_vm12, %v2789_v7, %v2838_v20  ;;  %v1368_v21 = vsel %vm1363_vm12, %v2838_v20, %v2839_v11  ;;  %v1306_v38 = vsel %vm4543_vm13, %v2784_v26, %v2833_v25  ;;  %v1307_v39 = vsel %vm4543_vm13, %v2833_v25, %v2834_v24  ;;  %v966_v20 = vld [vmem:[%s3450_s30 + $0x10] sm:$0x3] }
 0x130   : > { %v1877_v42 = vld [vmem:[#allocation2 + $0x218] sm:$0xff]  ;;  %1383 = vst [vmem:[#allocation2 + $0x50] sm:$0xf0] %v1367_v36  ;;  %1384 = vst [vmem:[#allocation2 + $0x80] sm:$0xf0] %v1368_v21  ;;  %v3900_v6 = vpop.permute.xlu1 %2846  ;;  %v3902_v7 = vpop.permute.xlu0 %2841  ;;  %vm4548_vm13 = vcmask 146432  }
 0x131   : > { %1322 = vst [vmem:[#allocation2 + $0x50] sm:$0xf] %v1306_v38  ;;  %1323 = vst [vmem:[#allocation2 + $0x80] sm:$0xf] %v1307_v39  ;;  %1968 = vmatpush1.msra.mxu0 %v1877_v42  ;;  %v2849_v9 = vunpack.i.h.bf16 %v3900_v6  ;;  %v2848_v26 = vunpack.i.l.bf16 %v3900_v6  ;;  %v2844_v17 = vunpack.i.h.bf16 %v3902_v7  ;;  %v2843_v46 = vunpack.i.l.bf16 %v3902_v7 }
 0x132   : > { %1240 = vrot.lane.b32.xlu1 %v1223_v32, %s4563_s28  ;;  %v1887_v32 = vld [vmem:[#allocation2 + $0x1e0] sm:$0xff]  ;;  %v3095_v39 = vpack.i.bf16 %v3909_v63, %v3928_v1  ;;  %v971_v42 = vunpack.c.l.bf16 %v966_v20 }
 0x133   : > { %1179 = vrot.lane.b32.xlu0 %v1153_v34, %s3294_s25  ;;  %v1122_v48 = vsel %vm4547_vm0, %v2848_v26, %v2828_v58  ;;  %v1124_v52 = vsel %vm4547_vm0, %v2829_v56, %v2849_v9  ;;  %v1061_v50 = vsel %vm4546_vm1, %v2843_v46, %v2823_v61  ;;  %v1063_v51 = vsel %vm4546_vm1, %v2824_v60, %v2844_v17  ;;  %v1870_v53 = vld [vmem:[#allocation2 + $0xf8] sm:$0xff] }
 0x134   : > { %1138 = vst [vmem:[#allocation2 + $0x270] sm:$0xf0] %v1122_v48  ;;  %1140 = vst [vmem:[#allocation2 + $0x1c8] sm:$0xf0] %v1124_v52  ;;  %v2857_v54 = vpop.permute.xlu1 %2856  ;;  %v2852_v37 = vpop.permute.xlu0 %2851  ;;  %1969 = vmatprep.subr.mxu0 %v1870_v53  ;;  %v1102_v60 = vcombine.low %v1092_v13, %v1092_v13  ;;  %v906_v52 = vld [vmem:[%s3450_s30 + $0x10] sm:$0x3]  ;;  %v981_v53 = vcombine.low %v971_v42, %v971_v42 }
 0x135   : > { %1077 = vst [vmem:[#allocation2 + $0x270] sm:$0xf] %v1061_v50  ;;  %1079 = vst [vmem:[#allocation2 + $0x1c8] sm:$0xf] %v1063_v51  ;;  %v2859_v58 = vunpack.i.h.bf16 %v2857_v54  ;;  %v2858_v56 = vunpack.i.l.bf16 %v2857_v54  ;;  %v2854_v62 = vunpack.i.h.bf16 %v2852_v37  ;;  %v2853_v61 = vunpack.i.l.bf16 %v2852_v37 }
 0x136   : > { %3086 = vrot.lane.b32.xlu1 %v3466_v14, %s3299_s17  ;;  %v911_v3 = vunpack.c.l.bf16 %v906_v52  ;;  %v557_v54 = vcombine.high %v3909_v63, %v3909_v63 }
 0x137   : > { %3081 = vrot.lane.b32.xlu0 %v3480_v30, %s4568_s11  ;;  %v1002_v2 = vsel %vm4549_vm2, %v2858_v56, %v2859_v58  ;;  %v941_v4 = vsel %vm4548_vm13, %v2853_v61, %v2854_v62 }
 0x138   : > { %v1888_v15 = vld [vmem:[#allocation2 + $0x50] sm:$0xff]  ;;  %1018 = vst [vmem:[#allocation2 + $0x228] sm:$0xf0] %v1002_v2  ;;  %957 = vst [vmem:[#allocation2 + $0x228] sm:$0xf] %v941_v4  ;;  %v3933_v25 = vpop.permute.xlu1 %2866  ;;  %v3935_v14 = vpop.permute.xlu0 %2861 }
 0x139   : > { %2036 = vmatprep.subr.mxu1 %v1888_v15  ;;  %v2869_v34 = vunpack.i.h.bf16 %v3933_v25  ;;  %v2868_v36 = vunpack.i.l.bf16 %v3933_v25  ;;  %v2864_v21 = vunpack.i.h.bf16 %v3935_v14  ;;  %v2863_v38 = vunpack.i.l.bf16 %v3935_v14  ;;  %v845_v15 = vld [vmem:[%s3450_s30 + $0x10] sm:$0x3] }
 0x13a   : > { %2037 = vmatpush1.msra.mxu1 %v1887_v32  ;;  %1119 = vrot.lane.b32.xlu1 %v1102_v60, %s4564_s4 }
 0x13b   : > { %1058 = vrot.lane.b32.xlu0 %v1032_v0, %s4565_s5  ;;  %v1246_v55 = vsel %vm4545_vm14, %v2819_v49, %v2868_v36  ;;  %v1247_v26 = vsel %vm4545_vm14, %v2868_v36, %v2869_v34  ;;  %v1185_v46 = vsel %vm4544_vm15, %v2814_v44, %v2863_v38  ;;  %v1186_v13 = vsel %vm4544_vm15, %v2863_v38, %v2864_v21 }
 0x13c   : > { %v1869_v48 = vld [vmem:[#allocation2 + $0x270] sm:$0xff]  ;;  %1262 = vst [vmem:[#allocation2 + $0xc8] sm:$0xf0] %v1246_v55  ;;  %1263 = vst [vmem:[#allocation2 + $0x338] sm:$0xf0] %v1247_v26  ;;  %v3958_v47 = vpop.permute.xlu1 %2876  ;;  %v3960_v49 = vpop.permute.xlu0 %2871  ;;  %vm879_vm15 = vcmask 211968   ;;  %v850_v36 = vunpack.c.l.bf16 %v845_v15 }
 0x13d   : > { %1201 = vst [vmem:[#allocation2 + $0xc8] sm:$0xf] %v1185_v46  ;;  %1202 = vst [vmem:[#allocation2 + $0x338] sm:$0xf] %v1186_v13  ;;  %1970 = vmatpush1.msra.mxu0 %v1869_v48  ;;  %v2879_v22 = vunpack.i.h.bf16 %v3958_v47  ;;  %v2878_v44 = vunpack.i.l.bf16 %v3958_v47  ;;  %v2874_v50 = vunpack.i.h.bf16 %v3960_v49  ;;  %v2873_v51 = vunpack.i.l.bf16 %v3960_v49  ;;  %v785_v26 = vld [vmem:[%s3450_s30 + $0x10] sm:$0x3] }
 0x13e   : > { %3096 = vrot.lane.b32.xlu1 %v3095_v39, %s3301_s18  ;;  %vm4550_vm14 = vcmask 220160   ;;  %v1879_v48 = vld [vmem:[#allocation2 + $0xa8] sm:$0xff] }
 0x13f   : > { %3091 = vrot.lane.b32.xlu0 %v3480_v30, %s3302_s29  ;;  %v1001_v37 = vsel %vm4549_vm2, %v2878_v44, %v2858_v56  ;;  %v1003_v60 = vsel %vm4549_vm2, %v2859_v58, %v2879_v22  ;;  %v940_v0 = vsel %vm4548_vm13, %v2873_v51, %v2853_v61  ;;  %v942_v2 = vsel %vm4548_vm13, %v2854_v62, %v2874_v50  ;;  %v1862_v4 = vld [vmem:[#allocation2 + $0x228] sm:$0xff] }
 0x140   : > { %1017 = vst [vmem:[#allocation2 + $0x2b8] sm:$0xf0] %v1001_v37  ;;  %1019 = vst [vmem:[#allocation2 + $0x178] sm:$0xf0] %v1003_v60  ;;  %v2887_v30 = vpop.permute.xlu1 %2886  ;;  %v2882_v56 = vpop.permute.xlu0 %2881  ;;  %1971 = vmatprep.subr.mxu0 %v1862_v4  ;;  %v3983_v62 = vpack.i.bf16 %v557_v54, %v3909_v63  ;;  %v790_v54 = vunpack.c.l.bf16 %v785_v26  ;;  %v724_v4 = vld [vmem:[%s3450_s30 + $0x10] sm:$0x3] }
 0x141   : > { %956 = vst [vmem:[#allocation2 + $0x2b8] sm:$0xf] %v940_v0  ;;  %958 = vst [vmem:[#allocation2 + $0x178] sm:$0xf] %v942_v2  ;;  %v2889_v20 = vunpack.i.h.bf16 %v2887_v30  ;;  %v2888_v58 = vunpack.i.l.bf16 %v2887_v30  ;;  %v2884_v32 = vunpack.i.h.bf16 %v2882_v56  ;;  %v2883_v61 = vunpack.i.l.bf16 %v2882_v56 }
 0x142   : > { %998 = vrot.lane.b32.xlu1 %v981_v53, %s4566_s6  ;;  %v3115_v56 = vpack.i.bf16 %v3928_v1, %v3611_v8 }
 0x143   : > { %937 = vrot.lane.b32.xlu0 %v911_v3, %s4567_s7  ;;  %v881_v38 = vsel %vm879_vm15, %v2888_v58, %v2889_v20  ;;  %v820_v42 = vsel %vm4550_vm14, %v2883_v61, %v2884_v32  ;;  %v860_v3 = vcombine.low %v850_v36, %v850_v36  ;;  %v729_v36 = vunpack.c.l.bf16 %v724_v4 }
 0x144   : > { %v1880_v55 = vld [vmem:[#allocation2 + $0xc8] sm:$0xff]  ;;  %897 = vst [vmem:[#allocation2 + $0x2f0] sm:$0xf0] %v881_v38  ;;  %836 = vst [vmem:[#allocation2 + $0x2f0] sm:$0xf] %v820_v42  ;;  %v3988_v46 = vpop.permute.xlu1 %2896  ;;  %v3990_v13 = vpop.permute.xlu0 %2891 }
 0x145   : > { %2038 = vmatprep.subr.mxu1 %v1880_v55  ;;  %v2899_v52 = vunpack.i.h.bf16 %v3988_v46  ;;  %v2898_v44 = vunpack.i.l.bf16 %v3988_v46  ;;  %v2894_v51 = vunpack.i.h.bf16 %v3990_v13  ;;  %v2893_v53 = vunpack.i.l.bf16 %v3990_v13  ;;  %v664_v38 = vld [vmem:[%s3450_s30 + $0x10] sm:$0x3] }
 0x146   : > { %2039 = vmatpush1.msra.mxu1 %v1879_v48  ;;  %3106 = vrot.lane.b32.xlu1 %v3095_v39, %s3303_s21 }
 0x147   : > { %3101 = vrot.lane.b32.xlu0 %v3983_v62, %s3304_s20  ;;  %v1125_v37 = vsel %vm4547_vm0, %v2849_v9, %v2898_v44  ;;  %v1126_v60 = vsel %vm4547_vm0, %v2898_v44, %v2899_v52  ;;  %v1064_v0 = vsel %vm4546_vm1, %v2844_v17, %v2893_v53  ;;  %v1065_v39 = vsel %vm4546_vm1, %v2893_v53, %v2894_v51  ;;  %v603_v53 = vld [vmem:[%s3450_s30 + $0x10] sm:$0x3] }
 0x148   : > { %v1861_v2 = vld [vmem:[#allocation2 + $0x2b8] sm:$0xff]  ;;  %1141 = vst [vmem:[#allocation2 + $0xb0] sm:$0xf0] %v1125_v37  ;;  %1142 = vst [vmem:[#allocation2 + $0x138] sm:$0xf0] %v1126_v60  ;;  %v4012_v6 = vpop.permute.xlu1 %2906  ;;  %v4014_v9 = vpop.permute.xlu0 %2901  ;;  %vm758_vm1 = vcmask 228352   ;;  %v669_v37 = vunpack.c.l.bf16 %v664_v38  ;;  %v608_v60 = vunpack.c.l.bf16 %v603_v53 }
 0x149   : > { %1080 = vst [vmem:[#allocation2 + $0xb0] sm:$0xf] %v1064_v0  ;;  %1081 = vst [vmem:[#allocation2 + $0x138] sm:$0xf] %v1065_v39  ;;  %1972 = vmatpush1.msra.mxu0 %v1861_v2  ;;  %v2909_v7 = vunpack.i.h.bf16 %v4012_v6  ;;  %v2908_v17 = vunpack.i.l.bf16 %v4012_v6  ;;  %v2904_v15 = vunpack.i.h.bf16 %v4014_v9  ;;  %v2903_v30 = vunpack.i.l.bf16 %v4014_v9 }
 0x14a   : > { %877 = vrot.lane.b32.xlu1 %v860_v3, %s3299_s17  ;;  %v482_v3 = vld [vmem:[%s3450_s30 + $0x10] sm:$0x3]  ;;  %vm697_vm0 = vcmask 867328  }
 0x14b   : > { %816 = vrot.lane.b32.xlu0 %v790_v54, %s4568_s11  ;;  %v880_v42 = vsel %vm879_vm15, %v2908_v17, %v2888_v58  ;;  %v882_v55 = vsel %vm879_vm15, %v2889_v20, %v2909_v7  ;;  %v819_v26 = vsel %vm4550_vm14, %v2903_v30, %v2883_v61  ;;  %v821_v48 = vsel %vm4550_vm14, %v2884_v32, %v2904_v15  ;;  %v1854_v44 = vld [vmem:[#allocation2 + $0x2f0] sm:$0xff] }
 0x14c   : > { %896 = vst [vmem:[#allocation2 + $0x1f8] sm:$0xf0] %v880_v42  ;;  %898 = vst [vmem:[#allocation2 + $0x358] sm:$0xf0] %v882_v55  ;;  %v2917_v8 = vpop.permute.xlu1 %2916  ;;  %v2912_v1 = vpop.permute.xlu0 %2911  ;;  %1973 = vmatprep.subr.mxu0 %v1854_v44  ;;  %v739_v32 = vcombine.low %v729_v36, %v729_v36  ;;  %v487_v0 = vunpack.c.l.bf16 %v482_v3  ;;  %v543_v17 = vld [vmem:[%s3450_s30 + $0x10] sm:$0x3] }
 0x14d   : > { %835 = vst [vmem:[#allocation2 + $0x1f8] sm:$0xf] %v819_v26  ;;  %837 = vst [vmem:[#allocation2 + $0x358] sm:$0xf] %v821_v48  ;;  %v2919_v20 = vunpack.i.h.bf16 %v2917_v8  ;;  %v2918_v58 = vunpack.i.l.bf16 %v2917_v8  ;;  %v2914_v61 = vunpack.i.h.bf16 %v2912_v1  ;;  %v2913_v54 = vunpack.i.l.bf16 %v2912_v1 }
 0x14e   : > { %3116 = vrot.lane.b32.xlu1 %v3115_v56, %s3305_s22  ;;  %v1871_v56 = vld [vmem:[#allocation2 + $0x1c8] sm:$0xff]  ;;  %v618_v26 = vcombine.low %v608_v60, %v608_v60  ;;  %v548_v48 = vunpack.c.l.bf16 %v543_v17  ;;  %v497_v44 = vcombine.low %v487_v0, %v487_v0 }
 0x14f   : > { %3111 = vrot.lane.b32.xlu0 %v3983_v62, %s3283_s24  ;;  %v760_v39 = vsel %vm758_vm1, %v2918_v58, %v2919_v20  ;;  %v699_v2 = vsel %vm697_vm0, %v2913_v54, %v2914_v61 }
 0x150   : > { %v1872_v4 = vld [vmem:[#allocation2 + $0xb0] sm:$0xff]  ;;  %776 = vst [vmem:[#allocation2 + $0x298] sm:$0xf0] %v760_v39  ;;  %715 = vst [vmem:[#allocation2 + $0x298] sm:$0xf] %v699_v2  ;;  %v4041_v30 = vpop.permute.xlu1 %2926  ;;  %v4043_v42 = vpop.permute.xlu0 %2921  ;;  %v3120_v39 = vpack.i.bf16 %v497_v44, %v3909_v63 }
 0x151   : > { %2040 = vmatprep.subr.mxu1 %v1872_v4  ;;  %v2929_v62 = vunpack.i.h.bf16 %v4041_v30  ;;  %v2928_v36 = vunpack.i.l.bf16 %v4041_v30  ;;  %v2924_v38 = vunpack.i.h.bf16 %v4043_v42  ;;  %v2923_v55 = vunpack.i.l.bf16 %v4043_v42 }
 0x152   : > { %2041 = vmatpush1.msra.mxu1 %v1871_v56  ;;  %756 = vrot.lane.b32.xlu1 %v739_v32, %s3301_s18 }
 0x153   : > { %695 = vrot.lane.b32.xlu0 %v669_v37, %s3302_s29  ;;  %v1004_v53 = vsel %vm4549_vm2, %v2879_v22, %v2928_v36  ;;  %v1005_v3 = vsel %vm4549_vm2, %v2928_v36, %v2929_v62  ;;  %v943_v8 = vsel %vm4548_vm13, %v2874_v50, %v2923_v55  ;;  %v944_v1 = vsel %vm4548_vm13, %v2923_v55, %v2924_v38  ;;  %v422_v37 = vld [vmem:[%s3450_s30 + $0x10] sm:$0x3]  ;;  %s2489_s30 = sshll.u32 %s3446_s23, 6  ;;  %s2377_s29 = scalar_lea.sflag [#allocation5], %s3446_s23 }
 0x154   : > { %v1853_v32 = vld [vmem:[#allocation2 + $0x1f8] sm:$0xff]  ;;  %1020 = vst [vmem:[#allocation2 + $0x200] sm:$0xf0] %v1004_v53  ;;  %1021 = vst [vmem:[#allocation2 + $0x2e8] sm:$0xf0] %v1005_v3  ;;  %v4064_v47 = vpop.permute.xlu1 %2936  ;;  %v4066_v22 = vpop.permute.xlu0 %2931  ;;  %v427_v2 = vunpack.c.l.bf16 %v422_v37  ;;  %vm637_vm13 = vcmask 875520  }
 0x155   : > { %959 = vst [vmem:[#allocation2 + $0x200] sm:$0xf] %v943_v8  ;;  %960 = vst [vmem:[#allocation2 + $0x2e8] sm:$0xf] %v944_v1  ;;  %1974 = vmatpush1.msra.mxu0 %v1853_v32  ;;  %v2939_v60 = vunpack.i.h.bf16 %v4064_v47  ;;  %v2938_v49 = vunpack.i.l.bf16 %v4064_v47  ;;  %v2934_v50 = vunpack.i.h.bf16 %v4066_v22  ;;  %v2933_v0 = vunpack.i.l.bf16 %v4066_v22  ;;  %v1863_v1 = vld [vmem:[#allocation2 + $0x178] sm:$0xff]  ;;  %s211_s10 = scalar_lea.vmem [#allocation9], %s2489_s30 }
 0x156   : > { %635 = vrot.lane.b32.xlu1 %v618_v26, %s3303_s21  ;;  %vm576_vm2 = vcmask 883712   ;;  %s2391_s17 = sshll.u32 %s211_s10, 4  ;;  %s4478_s17 = int_to_ptr.vmem [resolvable:$true] %s2391_s17 }
 0x157   : > { %574 = vrot.lane.b32.xlu0 %v548_v48, %s3304_s20  ;;  %v759_v4 = vsel %vm758_vm1, %v2938_v49, %v2918_v58  ;;  %v761_v17 = vsel %vm758_vm1, %v2919_v20, %v2939_v60  ;;  %v698_v56 = vsel %vm697_vm0, %v2933_v0, %v2913_v54  ;;  %v700_v36 = vsel %vm697_vm0, %v2914_v61, %v2934_v50  ;;  %v1846_v55 = vld [vmem:[#allocation2 + $0x298] sm:$0xff]  ;;  %s3207_s18 = scalar_lea.vmem %s4478_s17, 1024  ;;  %s3307_s20 = smov [#allocation9]  }
 0x158   : > { %775 = vst [vmem:[#allocation2 + $0xd8] sm:$0xf0] %v759_v4  ;;  %777 = vst [vmem:[#allocation2 + $0xb8] sm:$0xf0] %v761_v17  ;;  %v2947_v63 = vpop.permute.xlu1 %2946  ;;  %v2942_v26 = vpop.permute.xlu0 %2941  ;;  %1975 = vmatprep.subr.mxu0 %v1846_v55  ;;  %p3208_p13 = scmp.ne.s32.totalorder %s4478_s17, %s3207_s18  ;;  %s3211_s21 = sshll.u32 %s3307_s20, 4  ;;  %s3212_s21 = int_to_ptr.vmem [resolvable:$false] %s3211_s21 }
 0x159   : > { %714 = vst [vmem:[#allocation2 + $0xd8] sm:$0xf] %v698_v56  ;;  %716 = vst [vmem:[#allocation2 + $0xb8] sm:$0xf] %v700_v36  ;;  %v2949_v58 = vunpack.i.h.bf16 %v2947_v63  ;;  %v2948_v48 = vunpack.i.l.bf16 %v2947_v63  ;;  %v2944_v44 = vunpack.i.h.bf16 %v2942_v26  ;;  %v2943_v20 = vunpack.i.l.bf16 %v2942_v26  ;;  %s3213_s27 = scalar_lea.vmem %s3212_s21, 2048  ;;  %p3214_p4 = scmp.lt.s32.totalorder %s4478_s17, %s3212_s21 }
 0x15a   : > { %3121 = vrot.lane.b32.xlu1 %v3120_v39, %s3305_s22  ;;  %p3209_p1 = pnand %p3208_p13, %p4591_p0  ;;  %p3215_p6 = scmp.lt.s32.totalorder %s3213_s27, %s3207_s18 }
 0x15b   : > { %453 = vrot.lane.b32.xlu0 %v427_v2, %s3283_s24  ;;  %v639_v61 = vsel %vm637_vm13, %v2948_v48, %v2949_v58  ;;  %v578_v54 = vsel %vm576_vm2, %v2943_v20, %v2944_v44  ;;  %s2507_s24 = sshll.u32 %s3349_s16, 10 }
 0x15c   : > { %v1864_v53 = vld [vmem:[#allocation2 + $0x200] sm:$0xff]  ;;  %655 = vst [vmem:[#allocation2 + $0x120] sm:$0xf0] %v639_v61  ;;  %594 = vst [vmem:[#allocation2 + $0x120] sm:$0xf] %v578_v54  ;;  %v4087_v3 = vpop.permute.xlu1 %2956  ;;  %v4089_v8 = vpop.permute.xlu0 %2951  ;;  %s4476_s25 = scalar_lea.hbm %s4524_s3, %s2507_s24  ;;  %p3210_p2 = pneg %p3209_p1 }
 0x15d   : > { %2042 = vmatprep.subr.mxu1 %v1864_v53  ;;  %v2959_v32 = vunpack.i.h.bf16 %v4087_v3  ;;  %v2958_v37 = vunpack.i.l.bf16 %v4087_v3  ;;  %v2954_v49 = vunpack.i.h.bf16 %v4089_v8  ;;  %v2953_v0 = vunpack.i.l.bf16 %v4089_v8  ;;  %p3216_p8 = por %p3215_p6, %p3214_p4 }
 0x15e   : > { %2043 = vmatpush1.msra.mxu1 %v1863_v1 }
 0x15f   : > { %v883_v39 = vsel %vm879_vm15, %v2909_v7, %v2958_v37  ;;  %v884_v2 = vsel %vm879_vm15, %v2958_v37, %v2959_v32  ;;  %v822_v4 = vsel %vm4550_vm14, %v2904_v15, %v2953_v0  ;;  %v823_v17 = vsel %vm4550_vm14, %v2953_v0, %v2954_v49  ;;  %p3217_p12 = pnand %p3216_p8, %p3210_p2 }
 0x160   : > { %v1845_v56 = vld [vmem:[#allocation2 + $0xd8] sm:$0xff]  ;;  %899 = vst [vmem:[#allocation2 + $0x1c0] sm:$0xf0] %v883_v39  ;;  %900 = vst [vmem:[#allocation2 + $0x248] sm:$0xf0] %v884_v2  ;;  %v2967_v6 = vpop.permute.xlu1 %2966  ;;  %v2962_v36 = vpop.permute.xlu0 %2961  ;;  %vm516_vm14 = vcmask 949248  }
 0x161   : > { %838 = vst [vmem:[#allocation2 + $0x1c0] sm:$0xf] %v822_v4  ;;  %839 = vst [vmem:[#allocation2 + $0x248] sm:$0xf] %v823_v17  ;;  %1976 = vmatpush1.msra.mxu0 %v1845_v56  ;;  %v2969_v7 = vunpack.i.h.bf16 %v2967_v6  ;;  %v2968_v55 = vunpack.i.l.bf16 %v2967_v6  ;;  %v2964_v63 = vunpack.i.h.bf16 %v2962_v36  ;;  %v2963_v26 = vunpack.i.l.bf16 %v2962_v36  ;;  %v1855_v6 = vld [vmem:[#allocation2 + $0x358] sm:$0xff] }
 0x163   : > { %v638_v9 = vsel %vm637_vm13, %v2968_v55, %v2948_v48  ;;  %v640_v15 = vsel %vm637_vm13, %v2949_v58, %v2969_v7  ;;  %v577_v61 = vsel %vm576_vm2, %v2963_v26, %v2943_v20  ;;  %v579_v54 = vsel %vm576_vm2, %v2944_v44, %v2964_v63  ;;  %v1838_v53 = vld [vmem:[#allocation2 + $0x120] sm:$0xff] }
 0x164   : > { %654 = vst [vmem:[#allocation2 + $0x350] sm:$0xf0] %v638_v9  ;;  %656 = vst [vmem:[#allocation2 + $0x1a0] sm:$0xf0] %v640_v15  ;;  %v4111_v1 = vpop.permute.xlu1 %2976  ;;  %v2972_v37 = vpop.permute.xlu0 %2971  ;;  %1977 = vmatprep.subr.mxu0 %v1838_v53 }
 0x165   : > { %593 = vst [vmem:[#allocation2 + $0x350] sm:$0xf] %v577_v61  ;;  %595 = vst [vmem:[#allocation2 + $0x1a0] sm:$0xf] %v579_v54  ;;  %v2979_v0 = vunpack.i.h.bf16 %v4111_v1  ;;  %v2978_v48 = vunpack.i.l.bf16 %v4111_v1  ;;  %v2974_v39 = vunpack.i.h.bf16 %v2972_v37  ;;  %v2973_v58 = vunpack.i.l.bf16 %v2972_v37 }
 0x167   : > { %v701_v44 = vsel %vm697_vm0, %v2934_v50, %v2978_v48  ;;  %v702_v20 = vsel %vm697_vm0, %v2978_v48, %v2979_v0  ;;  %v518_v2 = vsel %vm516_vm14, %v2973_v58, %v2974_v39 }
 0x168   : > { %v1856_v4 = vld [vmem:[#allocation2 + $0x1c0] sm:$0xff]  ;;  %717 = vst [vmem:[#allocation2 + $0x170] sm:$0xf] %v701_v44  ;;  %718 = vst [vmem:[#allocation2 + $0x98] sm:$0xf] %v702_v20  ;;  %v2987_v17 = vpop.permute.xlu1 %2986  ;;  %v4122_v56 = vpop.permute.xlu0 %2981 }
 0x169   : > { %534 = vst [vmem:[#allocation2 + $0x330] sm:$0xf0] %v518_v2  ;;  %2044 = vmatprep.subr.mxu1 %v1856_v4  ;;  %v2989_v36 = vunpack.i.h.bf16 %v2987_v17  ;;  %v2988_v55 = vunpack.i.l.bf16 %v2987_v17  ;;  %v2984_v22 = vunpack.i.h.bf16 %v4122_v56  ;;  %v2983_v50 = vunpack.i.l.bf16 %v4122_v56 }
 0x16a   : > { %2045 = vmatpush1.msra.mxu1 %v1855_v6 }
 0x16b   : > { %v517_v26 = vsel %vm516_vm14, %v2988_v55, %v2973_v58  ;;  %v519_v9 = vsel %vm516_vm14, %v2974_v39, %v2989_v36  ;;  %v762_v15 = vsel %vm758_vm1, %v2939_v60, %v2983_v50  ;;  %v763_v61 = vsel %vm758_vm1, %v2983_v50, %v2984_v22  ;;  %v1811_v50 = vld [vmem:[#allocation6] sm:$0xf] }
 0x16c   : > { %v1837_v54 = vld [vmem:[#allocation2 + $0x350] sm:$0xff]  ;;  %533 = vst [vmem:[#allocation2 + $0x28] sm:$0xf0] %v517_v26  ;;  %535 = vst [vmem:[#allocation2 + $0x2d0] sm:$0xf0] %v519_v9  ;;  %v4134_v53 = vpop.permute.xlu1 %2996  ;;  %v4136_v37 = vpop.permute.xlu0 %2991 }
 0x16d   : > { %778 = vst [vmem:[#allocation2 + $0x170] sm:$0xf0] %v762_v15  ;;  %779 = vst [vmem:[#allocation2 + $0x98] sm:$0xf0] %v763_v61  ;;  %1978 = vmatpush1.msra.mxu0 %v1837_v54  ;;  %v2999_v48 = vunpack.i.h.bf16 %v4134_v53  ;;  %v2998_v47 = vunpack.i.l.bf16 %v4134_v53  ;;  %v2994_v60 = vunpack.i.h.bf16 %v4136_v37  ;;  %v2993_v39 = vunpack.i.l.bf16 %v4136_v37 }
 0x16f   : > { %v641_v58 = vsel %vm637_vm13, %v2969_v7, %v2998_v47  ;;  %v642_v44 = vsel %vm637_vm13, %v2998_v47, %v2999_v48  ;;  %v580_v20 = vsel %vm576_vm2, %v2964_v63, %v2993_v39  ;;  %v581_v2 = vsel %vm576_vm2, %v2993_v39, %v2994_v60  ;;  %v1822_v47 = vld [vmem:[#allocation2 + $0x110] sm:$0xff]  ;;  %v1847_v39 = vld [vmem:[#allocation2 + $0xb8] sm:$0xff] }
 0x170   : > { %v1830_v4 = vld [vmem:[#allocation2 + $0x330] sm:$0xff]  ;;  %657 = vst [vmem:[#allocation2 + $0x260] sm:$0xf0] %v641_v58  ;;  %658 = vst [vmem:[#allocation2 + $0xe0] sm:$0xf0] %v642_v44  ;;  %v4150_v17 = vpop.permute.xlu1 %506  ;;  %v4152_v6 = vpop.permute.xlu0 %3001  ;;  %v4166_v58 = vunpack.c.l.bf16 %v1811_v50 }
 0x171   : > { %596 = vst [vmem:[#allocation2 + $0x260] sm:$0xf] %v580_v20  ;;  %597 = vst [vmem:[#allocation2 + $0xe0] sm:$0xf] %v581_v2  ;;  %1979 = vmatprep.subr.mxu0 %v1830_v4  ;;  %v520_v7 = vsel %vm516_vm14, %v2989_v36, %v4150_v17  ;;  %v3004_v55 = vunpack.i.h.bf16 %v4152_v6  ;;  %v3003_v63 = vunpack.i.l.bf16 %v4152_v6  ;;  %v1821_v2 = vld [vmem:[#allocation2 + $0x108] sm:$0xff]  ;;  %v1814_v4 = vld [vmem:[#allocation2 + $0xd0] sm:$0xff] }
 0x172   : > { %536 = vst [vmem:[#allocation2 + $0x198] sm:$0xf0] %v520_v7 }
 0x173   : > { %v459_v26 = vsel %vm455_vm3, %v2674_v16, %v3003_v63  ;;  %v460_v9 = vsel %vm455_vm3, %v3003_v63, %v3004_v55  ;;  %v1829_v15 = vld [vmem:[#allocation2 + $0x28] sm:$0xff]  ;;  %v1831_v28 = vld [vmem:[#allocation2 + $0x2d0] sm:$0xff] }
 0x174   : > { %v1848_v61 = vld [vmem:[#allocation2 + $0x170] sm:$0xff]  ;;  %475 = vst [vmem:[#allocation2 + $0x198] sm:$0xf] %v459_v26  ;;  %476 = vst [vmem:[#allocation2 + $0x1a8] sm:$0xf] %v460_v9  ;;  %v4164_v54 = vpop.permute.xlu1 %3011  ;;  %v3007_v36 = vpop.permute.xlu0 %3006  ;;  %1980 = vmatpush1.msra.mxu0 %v1829_v15 }
 0x175   : > { %2046 = vmatprep.subr.mxu1 %v1848_v61  ;;  %v3014_v12 = vunpack.i.h.bf16 %v4164_v54  ;;  %v3013_v16 = vunpack.i.l.bf16 %v4164_v54  ;;  %v3009_v44 = vunpack.i.h.bf16 %v3007_v36  ;;  %v3008_v20 = vunpack.i.l.bf16 %v3007_v36  ;;  %1981 = vmatprep.subr.mxu0 %v1822_v47  ;;  %v1813_v9 = vld [vmem:[#allocation2 + $0x2b0] sm:$0xff]  ;;  %v1839_v61 = vld [vmem:[#allocation2 + $0x1a0] sm:$0xff] }
 0x176   : > { %2047 = vmatpush1.msra.mxu1 %v1847_v39  ;;  %1982 = vmatpush1.msra.mxu0 %v1821_v2 }
 0x177   : > { %v1671_v7 = vsel %vm1665_vm5, %v2744_v45, %v3013_v16  ;;  %v1672_v63 = vsel %vm1665_vm5, %v3013_v16, %v3014_v12  ;;  %v1792_v50 = vsel %vm1786_vm4, %v2719_v59, %v3008_v20  ;;  %v1793_v26 = vsel %vm1786_vm4, %v3008_v20, %v3009_v44  ;;  %1983 = vmatprep.subr.mxu0 %v1814_v4 }
 0x178   : > { %v1840_v15 = vld [vmem:[#allocation2 + $0x260] sm:$0xff]  ;;  %1687 = vst [vmem:[#allocation2 + $0x368] sm:$0xf] %v1671_v7  ;;  %1688 = vst [vmem:[#allocation2 + $0x180] sm:$0xf] %v1672_v63  ;;  %v4180_v41 = vpop.permute.xlu1 %3021  ;;  %v4182_v45 = vpop.permute.xlu0 %3016  ;;  %1984 = vmatpush1.msra.mxu0 %v1813_v9 }
 0x179   : > { %1808 = vst [vmem:[#allocation2 + $0x2a0] sm:$0xf] %v1792_v50  ;;  %1809 = vst [vmem:[#allocation2 + $0x1b0] sm:$0xf] %v1793_v26  ;;  %2048 = vmatprep.subr.mxu1 %v1840_v15  ;;  %v3024_v57 = vunpack.i.h.bf16 %v4180_v41  ;;  %v3023_v59 = vunpack.i.l.bf16 %v4180_v41  ;;  %v3019_v36 = vunpack.i.h.bf16 %v4182_v45  ;;  %v3018_v47 = vunpack.i.l.bf16 %v4182_v45  ;;  %2492 = vmatmul.mubr.msk.f32.vlgmr.msra.gmra.mxu0 %vm576_vm2, %v4166_v58  ;;  %v1823_v26 = vld [vmem:[#allocation2 + $0x90] sm:$0xff]  ;;  %v1816_v45 = vld [vmem:[#allocation2 + $0x48] sm:$0xff] }
 0x17a   : > { %2049 = vmatpush1.msra.mxu1 %v1839_v61  ;;  %2159 = vmatprep.mubr.f32.mxu0 %v3306_v29 }
 0x17b   : > { %v1550_v39 = vsel %vm1544_vm8, %v2774_v35, %v3023_v59  ;;  %v1551_v16 = vsel %vm1544_vm8, %v3023_v59, %v3024_v57  ;;  %v1732_v20 = vsel %vm1726_vm6, %v2749_v43, %v3018_v47  ;;  %v1733_v2 = vsel %vm1726_vm6, %v3018_v47, %v3019_v36  ;;  %v1832_v4 = vld [vmem:[#allocation2 + $0x198] sm:$0xff]  ;;  %v1815_v47 = vld [vmem:[#allocation2 + $0x10] sm:$0xff] }
 0x17c   : > { %1566 = vst [vmem:[#allocation2 + $0x300] sm:$0xf] %v1550_v39  ;;  %1567 = vst [vmem:[#allocation2 + $0x308] sm:$0xf] %v1551_v16  ;;  %v1785_v7 = vpop.permute.xlu1 %1784  ;;  %v4201_v63 = vpop.permute.xlu0 %3026  ;;  %2050 = vmatprep.subr.mxu1 %v1832_v4  ;;  %v1824_v43 = vld [vmem:[#allocation2 + $0x318] sm:$0xff] }
 0x17d   : > { %1748 = vst [vmem:[#allocation2 + $0x368] sm:$0xf0] %v1732_v20  ;;  %1749 = vst [vmem:[#allocation2 + $0x180] sm:$0xf0] %v1733_v2  ;;  %v1794_v35 = vsel %vm1786_vm4, %v3009_v44, %v1785_v7  ;;  %v3029_v50 = vunpack.i.h.bf16 %v4201_v63  ;;  %v3028_v40 = vunpack.i.l.bf16 %v4201_v63  ;;  %2051 = vmatpush1.msra.mxu1 %v1831_v28  ;;  %vm4569_vm4 = vcmask 457728  }
 0x17e   : > { %1810 = vst [vmem:[#allocation2 + $0x150] sm:$0xf] %v1794_v35  ;;  %2052 = vmatprep.subr.mxu1 %v1824_v43 }
 0x17f   : > { %v1611_v9 = vsel %vm1605_vm9, %v2779_v33, %v3028_v40  ;;  %v1612_v15 = vsel %vm1605_vm9, %v3028_v40, %v3029_v50  ;;  %2053 = vmatpush1.msra.mxu1 %v1823_v26  ;;  %v1913_v40 = vld [vmem:[#allocation2 + $0x88] sm:$0xff] }
 0x180   : > { %v1922_v44 = vld [vmem:[#allocation2 + $0x2a0] sm:$0xf]  ;;  %1627 = vst [vmem:[#allocation2 + $0x300] sm:$0xf0] %v1611_v9  ;;  %1628 = vst [vmem:[#allocation2 + $0x308] sm:$0xf0] %v1612_v15  ;;  %v4212_v61 = vpop.permute.xlu1 %3036  ;;  %v4214_v59 = vpop.permute.xlu0 %3031  ;;  %2054 = vmatprep.subr.mxu1 %v1816_v45 }
 0x181   : > { %2496 = vmatprep.subr.msk.mxu0 %vm1928_vm7, %v1922_v44  ;;  %v3039_v33 = vunpack.i.h.bf16 %v4212_v61  ;;  %v3038_v39 = vunpack.i.l.bf16 %v4212_v61  ;;  %v3034_v16 = vunpack.i.h.bf16 %v4214_v59  ;;  %v3033_v20 = vunpack.i.l.bf16 %v4214_v59  ;;  %2055 = vmatpush1.msra.mxu1 %v1815_v47 }
 0x182   : > { %2497 = vmatpush1.msk.msra.mxu0 %vm1928_vm7, %v1921_v27  ;;  %2495 = vmatmul.mubr.msk.f32.vlgmr.msra.gmra.mxu1 %vm576_vm2, %v4166_v58 }
 0x183   : > { %v1490_v2 = vsel %vm1484_vm10, %v2809_v23, %v3038_v39  ;;  %v1491_v4 = vsel %vm1484_vm10, %v3038_v39, %v3039_v33  ;;  %v1429_v7 = vsel %vm1423_vm11, %v2804_v31, %v3033_v20  ;;  %v1430_v28 = vsel %vm1423_vm11, %v3033_v20, %v3034_v16  ;;  %2230 = vmatprep.mubr.f32.mxu1 %v3306_v29  ;;  %v1923_v29 = vld [vmem:[#allocation2 + $0x1b0] sm:$0xf] }
 0x184   : > { %v1914_v35 = vld [vmem:[#allocation2 + $0x368] sm:$0xff]  ;;  %1506 = vst [vmem:[#allocation2 + $0x238] sm:$0xf0] %v1490_v2  ;;  %1507 = vst [vmem:[#allocation2 + $0x2c8] sm:$0xf0] %v1491_v4  ;;  %v1725_v18 = vpop.permute.xlu1 %1724  ;;  %v1664_v23 = vpop.permute.xlu0 %1663 }
 0x185   : > { %1445 = vst [vmem:[#allocation2 + $0x238] sm:$0xf] %v1429_v7  ;;  %1446 = vst [vmem:[#allocation2 + $0x2c8] sm:$0xf] %v1430_v28  ;;  %2101 = vmatprep.subr.mxu0 %v1914_v35  ;;  %v1734_v43 = vsel %vm1726_vm6, %v3019_v36, %v1725_v18  ;;  %v1673_v19 = vsel %vm1665_vm5, %v3014_v12, %v1664_v23  ;;  %v1924_v31 = vld [vmem:[#allocation2 + $0x150] sm:$0xf] }
 0x186   : > { %2102 = vmatpush1.msra.mxu0 %v1913_v40  ;;  %1750 = vst [vmem:[#allocation2 + $0x250] sm:$0xf0] %v1734_v43  ;;  %1689 = vst [vmem:[#allocation2 + $0x250] sm:$0xf] %v1673_v19  ;;  %2499 = vmatprep.subr.msk.mxu1 %vm1928_vm7, %v1924_v31  ;;  %v1905_v36 = vld [vmem:[#allocation2 + $0x280] sm:$0xff]  ;;  %vm4571_vm6 = vcmask 48128  }
 0x187   : > { %2500 = vmatpush1.msk.msra.mxu1 %vm1928_vm7, %v1923_v29  ;;  %v1906_v26 = vld [vmem:[#allocation2 + $0x300] sm:$0xff]  ;;  %vm4570_vm5 = vmmov %vm4569_vm4 }
 0x188   : > { %v4243_v9 = vpop.permute.xlu1 %3046  ;;  %2103 = vmatprep.subr.mxu0 %v1906_v26  ;;  %v1915_v28 = vld [vmem:[#allocation2 + $0x180] sm:$0xff]  ;;  %vm4572_vm7 = vmmov %vm4571_vm6 }
 0x189   : > { %v4245_v15 = vpop.permute.xlu0 %3041  ;;  %v3049_v54 = vunpack.i.h.bf16 %v4243_v9  ;;  %v3048_v12 = vunpack.i.l.bf16 %v4243_v9  ;;  %2104 = vmatpush1.msra.mxu0 %v1905_v36  ;;  %v1907_v36 = vld [vmem:[#allocation2 + $0x308] sm:$0xff] }
 0x18a   : > { %v3044_v45 = vunpack.i.h.bf16 %v4245_v15  ;;  %v3043_v44 = vunpack.i.l.bf16 %v4245_v15 }
 0x18b   : > { %v1369_v47 = vsel %vm1363_vm12, %v2839_v11, %v3048_v12  ;;  %v1370_v27 = vsel %vm1363_vm12, %v3048_v12, %v3049_v54  ;;  %v1897_v11 = vld [vmem:[#allocation2 + $0x188] sm:$0xff] }
 0x18c   : > { %v1308_v39 = vsel %vm4569_vm4, %v2834_v24, %v3043_v44  ;;  %v1309_v20 = vsel %vm4570_vm5, %v3043_v44, %v3044_v45  ;;  %v1898_v2 = vld [vmem:[#allocation2 + $0x238] sm:$0xff]  ;;  %1385 = vst [vmem:[#allocation2 + $0x1f0] sm:$0xf0] %v1369_v47  ;;  %1386 = vst [vmem:[#allocation2 + $0x160] sm:$0xf0] %v1370_v27  ;;  %v1604_v5 = vpop.permute.xlu1 %1603  ;;  %vm4577_vm4 = vcmask 130048  }
 0x18d   : > { %1324 = vst [vmem:[#allocation2 + $0x1f0] sm:$0xf] %v1308_v39  ;;  %1325 = vst [vmem:[#allocation2 + $0x160] sm:$0xf] %v1309_v20  ;;  %v1543_v4 = vpop.permute.xlu0 %1542  ;;  %2105 = vmatprep.subr.mxu0 %v1898_v2  ;;  %v1613_v7 = vsel %vm1605_vm9, %v3029_v50, %v1604_v5  ;;  %v1916_v24 = vld [vmem:[#allocation2 + $0x250] sm:$0xff] }
 0x18e   : > { %v1552_v10 = vsel %vm1544_vm8, %v3024_v57, %v1543_v4  ;;  %2106 = vmatpush1.msra.mxu0 %v1897_v11  ;;  %1629 = vst [vmem:[#allocation2 + $0x290] sm:$0xf0] %v1613_v7  ;;  %2172 = vmatprep.subr.mxu1 %v1916_v24  ;;  %vm4573_vm8 = vcmask 56320   ;;  %vm4578_vm5 = vmmov %vm4577_vm4  ;;  %v1899_v11 = vld [vmem:[#allocation2 + $0x2c8] sm:$0xff] }
 0x18f   : > { %1568 = vst [vmem:[#allocation2 + $0x290] sm:$0xf] %v1552_v10  ;;  %2173 = vmatpush1.msra.mxu1 %v1915_v28  ;;  %vm4574_vm9 = vmmov %vm4573_vm8 }
 0x190   : > { %v4269_v35 = vpop.permute.xlu1 %3056 }
 0x191   : > { %v4271_v18 = vpop.permute.xlu0 %3051  ;;  %v3059_v23 = vunpack.i.h.bf16 %v4269_v35  ;;  %v3058_v63 = vunpack.i.l.bf16 %v4269_v35 }
 0x192   : > { %v3054_v50 = vunpack.i.h.bf16 %v4271_v18  ;;  %v3053_v41 = vunpack.i.l.bf16 %v4271_v18 }
 0x193   : > { %v1248_v57 = vsel %vm4571_vm6, %v2869_v34, %v3058_v63  ;;  %v1249_v40 = vsel %vm4572_vm7, %v3058_v63, %v3059_v23  ;;  %v1889_v34 = vld [vmem:[#allocation2 + $0x80] sm:$0xff]  ;;  %vm4579_vm6 = vcmask 457728  }
 0x194   : > { %v1187_v43 = vsel %vm4573_vm8, %v2864_v21, %v3053_v41  ;;  %v1188_v19 = vsel %vm4574_vm9, %v3053_v41, %v3054_v50  ;;  %v1890_v31 = vld [vmem:[#allocation2 + $0x1f0] sm:$0xff]  ;;  %1264 = vst [vmem:[#allocation2 + $0x230] sm:$0xf0] %v1248_v57  ;;  %1265 = vst [vmem:[#allocation2 + $0xc0] sm:$0xf0] %v1249_v40  ;;  %v1483_v25 = vpop.permute.xlu1 %1482  ;;  %vm4582_vm8 = vcmask 146432  }
 0x195   : > { %1203 = vst [vmem:[#allocation2 + $0x230] sm:$0xf] %v1187_v43  ;;  %1204 = vst [vmem:[#allocation2 + $0xc0] sm:$0xf] %v1188_v19  ;;  %v1422_v29 = vpop.permute.xlu0 %1421  ;;  %2107 = vmatprep.subr.mxu0 %v1890_v31  ;;  %v1492_v26 = vsel %vm1484_vm10, %v3039_v33, %v1483_v25  ;;  %vm4575_vm10 = vcmask 64512   ;;  %v1891_v19 = vld [vmem:[#allocation2 + $0x160] sm:$0xff] }
 0x196   : > { %v1431_v14 = vsel %vm1423_vm11, %v3034_v16, %v1422_v29  ;;  %2108 = vmatpush1.msra.mxu0 %v1889_v34  ;;  %v1908_v21 = vld [vmem:[#allocation2 + $0x290] sm:$0xff]  ;;  %1508 = vst [vmem:[#allocation2 + $0x70] sm:$0xf0] %v1492_v26  ;;  %vm4576_vm11 = vmmov %vm4575_vm10 }
 0x197   : > { %1447 = vst [vmem:[#allocation2 + $0x70] sm:$0xf] %v1431_v14  ;;  %2174 = vmatprep.subr.mxu1 %v1908_v21  ;;  %vm4583_vm9 = vmmov %vm4582_vm8 }
 0x198   : > { %2175 = vmatpush1.msra.mxu1 %v1907_v36  ;;  %v4295_v12 = vpop.permute.xlu1 %3066 }
 0x199   : > { %v4297_v44 = vpop.permute.xlu0 %3061  ;;  %v3069_v47 = vunpack.i.h.bf16 %v4295_v12  ;;  %v3068_v61 = vunpack.i.l.bf16 %v4295_v12 }
 0x19a   : > { %v3064_v33 = vunpack.i.h.bf16 %v4297_v44  ;;  %v3063_v59 = vunpack.i.l.bf16 %v4297_v44 }
 0x19b   : > { %v1127_v16 = vsel %vm4575_vm10, %v2899_v52, %v3068_v61  ;;  %v1128_v27 = vsel %vm4576_vm11, %v3068_v61, %v3069_v47  ;;  %v1881_v52 = vld [vmem:[#allocation2 + $0x338] sm:$0xff]  ;;  %vm4584_vm10 = vcmask 48128   ;;  %vm4585_vm11 = vcmask 56320  }
 0x19c   : > { %v1066_v39 = vsel %vm4577_vm4, %v2894_v51, %v3063_v59  ;;  %v1067_v20 = vsel %vm4578_vm5, %v3063_v59, %v3064_v33  ;;  %v1882_v2 = vld [vmem:[#allocation2 + $0x230] sm:$0xff]  ;;  %1143 = vst [vmem:[#allocation2 + $0x2c0] sm:$0xf0] %v1127_v16  ;;  %1144 = vst [vmem:[#allocation2 + $0xe8] sm:$0xf0] %v1128_v27  ;;  %v1362_v46 = vpop.permute.xlu1 %1361  ;;  %vm4586_vm4 = vcmask 220160  }
 0x19d   : > { %1082 = vst [vmem:[#allocation2 + $0x2c0] sm:$0xf] %v1066_v39  ;;  %1083 = vst [vmem:[#allocation2 + $0xe8] sm:$0xf] %v1067_v20  ;;  %v1301_v5 = vpop.permute.xlu0 %1300  ;;  %2109 = vmatprep.subr.mxu0 %v1882_v2  ;;  %v1371_v4 = vsel %vm1363_vm12, %v3049_v54, %v1362_v46  ;;  %vm4580_vm12 = vcmask 138240   ;;  %v1883_v59 = vld [vmem:[#allocation2 + $0xc0] sm:$0xff] }
 0x19e   : > { %v1310_v13 = vsel %vm4579_vm6, %v3044_v45, %v1301_v5  ;;  %2110 = vmatpush1.msra.mxu0 %v1881_v52  ;;  %v1900_v51 = vld [vmem:[#allocation2 + $0x70] sm:$0xff]  ;;  %1387 = vst [vmem:[#allocation2 + $0x60] sm:$0xf0] %v1371_v4  ;;  %vm4581_vm7 = vmmov %vm4580_vm12  ;;  %vm4588_vm6 = vcmask 64512  }
 0x19f   : > { %1326 = vst [vmem:[#allocation2 + $0x60] sm:$0xf] %v1310_v13  ;;  %2176 = vmatprep.subr.mxu1 %v1900_v51  ;;  %vm4587_vm5 = vmmov %vm4586_vm4 }
 0x1a0   : > { %2177 = vmatpush1.msra.mxu1 %v1899_v11  ;;  %v4321_v7 = vpop.permute.xlu1 %3076 }
 0x1a1   : > { %v4323_v10 = vpop.permute.xlu0 %3071  ;;  %v3079_v24 = vunpack.i.h.bf16 %v4321_v7  ;;  %v3078_v9 = vunpack.i.l.bf16 %v4321_v7 }
 0x1a2   : > { %v3074_v54 = vunpack.i.h.bf16 %v4323_v10  ;;  %v3073_v15 = vunpack.i.l.bf16 %v4323_v10 }
 0x1a3   : > { %v1006_v45 = vsel %vm4580_vm12, %v2929_v62, %v3078_v9  ;;  %v1007_v28 = vsel %vm4581_vm7, %v3078_v9, %v3079_v24  ;;  %v1873_v62 = vld [vmem:[#allocation2 + $0x138] sm:$0xff]  ;;  %vm4589_vm12 = vcmask 130048  }
 0x1a4   : > { %v945_v63 = vsel %vm4582_vm8, %v2924_v38, %v3073_v15  ;;  %v946_v41 = vsel %vm4583_vm9, %v3073_v15, %v3074_v54  ;;  %v1874_v57 = vld [vmem:[#allocation2 + $0x2c0] sm:$0xff]  ;;  %1022 = vst [vmem:[#allocation2 + $0x208] sm:$0xf0] %v1006_v45  ;;  %1023 = vst [vmem:[#allocation2 + $0x2f8] sm:$0xf0] %v1007_v28  ;;  %v1241_v30 = vpop.permute.xlu1 %1240  ;;  %v1875_v13 = vld [vmem:[#allocation2 + $0xe8] sm:$0xff] }
 0x1a5   : > { %961 = vst [vmem:[#allocation2 + $0x208] sm:$0xf] %v945_v63  ;;  %962 = vst [vmem:[#allocation2 + $0x2f8] sm:$0xf] %v946_v41  ;;  %v1180_v40 = vpop.permute.xlu0 %1179  ;;  %2111 = vmatprep.subr.mxu0 %v1874_v57  ;;  %v1250_v43 = vsel %vm4584_vm10, %v3059_v23, %v1241_v30  ;;  %v1849_v30 = vld [vmem:[#allocation2 + $0x98] sm:$0xff] }
 0x1a6   : > { %v1189_v42 = vsel %vm4585_vm11, %v3054_v50, %v1180_v40  ;;  %2112 = vmatpush1.msra.mxu0 %v1873_v62  ;;  %v1892_v38 = vld [vmem:[#allocation2 + $0x60] sm:$0xff]  ;;  %1266 = vst [vmem:[#allocation2 + $0x128] sm:$0xf0] %v1250_v43  ;;  %vm4590_vm9 = vmmov %vm4586_vm4 }
 0x1a7   : > { %1205 = vst [vmem:[#allocation2 + $0x128] sm:$0xf] %v1189_v42  ;;  %2178 = vmatprep.subr.mxu1 %v1892_v38 }
 0x1a8   : > { %2179 = vmatpush1.msra.mxu1 %v1891_v19  ;;  %v4347_v31 = vpop.permute.xlu1 %3086 }
 0x1a9   : > { %v4349_v25 = vpop.permute.xlu0 %3081  ;;  %v3089_v29 = vunpack.i.h.bf16 %v4347_v31  ;;  %v3088_v35 = vunpack.i.l.bf16 %v4347_v31 }
 0x1aa   : > { %v3084_v23 = vunpack.i.h.bf16 %v4349_v25  ;;  %v3083_v18 = vunpack.i.l.bf16 %v4349_v25 }
 0x1ab   : > { %v885_v50 = vsel %vm879_vm15, %v2959_v32, %v3088_v35  ;;  %v886_v34 = vsel %vm879_vm15, %v3088_v35, %v3089_v29  ;;  %v1865_v32 = vld [vmem:[#allocation2 + $0x2e8] sm:$0xff] }
 0x1ac   : > { %v824_v26 = vsel %vm4586_vm4, %v2954_v49, %v3083_v18  ;;  %v825_v14 = vsel %vm4587_vm5, %v3083_v18, %v3084_v23  ;;  %v1866_v21 = vld [vmem:[#allocation2 + $0x208] sm:$0xff]  ;;  %901 = vst [vmem:[#allocation2 + $0x340] sm:$0xf0] %v885_v50  ;;  %902 = vst [vmem:[#allocation2 + $0x2a8] sm:$0xf0] %v886_v34  ;;  %v1120_v3 = vpop.permute.xlu1 %1119  ;;  %v1841_v34 = vld [vmem:[#allocation2 + $0xe0] sm:$0xff] }
 0x1ad   : > { %840 = vst [vmem:[#allocation2 + $0x340] sm:$0xf] %v824_v26  ;;  %841 = vst [vmem:[#allocation2 + $0x2a8] sm:$0xf] %v825_v14  ;;  %v1059_v36 = vpop.permute.xlu0 %1058  ;;  %2113 = vmatprep.subr.mxu0 %v1866_v21  ;;  %v1129_v61 = vsel %vm4588_vm6, %v3069_v47, %v1120_v3 }
 0x1ae   : > { %v1068_v8 = vsel %vm4589_vm12, %v3064_v33, %v1059_v36  ;;  %2114 = vmatpush1.msra.mxu0 %v1865_v32  ;;  %v1884_v49 = vld [vmem:[#allocation2 + $0x128] sm:$0xff]  ;;  %1145 = vst [vmem:[#allocation2 + $0x1d8] sm:$0xf0] %v1129_v61 }
 0x1af   : > { %1084 = vst [vmem:[#allocation2 + $0x1d8] sm:$0xf] %v1068_v8  ;;  %2180 = vmatprep.subr.mxu1 %v1884_v49 }
 0x1b0   : > { %2181 = vmatpush1.msra.mxu1 %v1883_v59  ;;  %v4373_v16 = vpop.permute.xlu1 %3096 }
 0x1b1   : > { %v4375_v27 = vpop.permute.xlu0 %3091  ;;  %v3099_v39 = vunpack.i.h.bf16 %v4373_v16  ;;  %v3098_v12 = vunpack.i.l.bf16 %v4373_v16 }
 0x1b2   : > { %v3094_v47 = vunpack.i.h.bf16 %v4375_v27  ;;  %v3093_v44 = vunpack.i.l.bf16 %v4375_v27 }
 0x1b3   : > { %v764_v33 = vsel %vm758_vm1, %v2984_v22, %v3098_v12  ;;  %v765_v20 = vsel %vm758_vm1, %v3098_v12, %v3099_v39  ;;  %v1857_v22 = vld [vmem:[#allocation2 + $0x248] sm:$0xff] }
 0x1b4   : > { %v703_v2 = vsel %vm697_vm0, %v2979_v0, %v3093_v44  ;;  %v704_v46 = vsel %vm697_vm0, %v3093_v44, %v3094_v47  ;;  %v1858_v5 = vld [vmem:[#allocation2 + $0x340] sm:$0xff]  ;;  %780 = vst [vmem:[#allocation2 + $0xa0] sm:$0xf0] %v764_v33  ;;  %781 = vst [vmem:[#allocation2 + $0x320] sm:$0xf0] %v765_v20  ;;  %v999_v56 = vpop.permute.xlu1 %998  ;;  %v1859_v26 = vld [vmem:[#allocation2 + $0x2a8] sm:$0xff] }
 0x1b5   : > { %719 = vst [vmem:[#allocation2 + $0xa0] sm:$0xf] %v703_v2  ;;  %720 = vst [vmem:[#allocation2 + $0x320] sm:$0xf] %v704_v46  ;;  %v938_v52 = vpop.permute.xlu0 %937  ;;  %2115 = vmatprep.subr.mxu0 %v1858_v5  ;;  %v1008_v4 = vsel %vm4581_vm7, %v3079_v24, %v999_v56  ;;  %v1818_v2 = vld [vmem:[#allocation2 + $0x328] sm:$0xff]  ;;  %v1817_v46 = vld [vmem:[#allocation2 + $0x360] sm:$0xff] }
 0x1b6   : > { %v947_v1 = vsel %vm4582_vm8, %v3074_v54, %v938_v52  ;;  %2116 = vmatpush1.msra.mxu0 %v1857_v22  ;;  %v1876_v0 = vld [vmem:[#allocation2 + $0x1d8] sm:$0xff]  ;;  %1024 = vst [vmem:[#allocation2 + $0x268] sm:$0xf0] %v1008_v4 }
 0x1b7   : > { %963 = vst [vmem:[#allocation2 + $0x268] sm:$0xf] %v947_v1  ;;  %2182 = vmatprep.subr.mxu1 %v1876_v0  ;;  %v1828_v4 = vld [vmem:[#allocation2 + $0x2d8] sm:$0xff] }
 0x1b8   : > { %2183 = vmatpush1.msra.mxu1 %v1875_v13  ;;  %v3107_v51 = vpop.permute.xlu1 %3106  ;;  %v1827_v1 = vld [vmem:[#allocation2 + $0x58] sm:$0xff]  ;;  %v1819_v13 = vld [vmem:[#allocation2 + $0x40] sm:$0xff] }
 0x1b9   : > { %v3102_v11 = vpop.permute.xlu0 %3101  ;;  %v3109_v9 = vunpack.i.h.bf16 %v3107_v51  ;;  %v3108_v15 = vunpack.i.l.bf16 %v3107_v51  ;;  %v1820_v0 = vld [vmem:[#allocation2 + $0x378] sm:$0xff]  ;;  %v2239_v51 = vlaneseq }
 0x1ba   : > { %v3104_v45 = vunpack.i.h.bf16 %v3102_v11  ;;  %v3103_v28 = vunpack.i.l.bf16 %v3102_v11 }
 0x1bb   : > { %v643_v7 = vsel %vm637_vm13, %v2999_v48, %v3108_v15  ;;  %v644_v10 = vsel %vm637_vm13, %v3108_v15, %v3109_v9  ;;  %v2240_v11 = vshrl.u32 %v2239_v51, 7 }
 0x1bc   : > { %v582_v24 = vsel %vm576_vm2, %v2994_v60, %v3103_v28  ;;  %v583_v54 = vsel %vm576_vm2, %v3103_v28, %v3104_v45  ;;  %v1850_v63 = vld [vmem:[#allocation2 + $0xa0] sm:$0xff]  ;;  %659 = vst [vmem:[#allocation2 + $0x130] sm:$0xf0] %v643_v7  ;;  %660 = vst [vmem:[#allocation2 + $0x1e8] sm:$0xf0] %v644_v10  ;;  %v878_v41 = vpop.permute.xlu1 %877  ;;  %v1867_v60 = vld [vmem:[#allocation2 + $0x2f8] sm:$0xff] }
 0x1bd   : > { %598 = vst [vmem:[#allocation2 + $0x130] sm:$0xf] %v582_v24  ;;  %599 = vst [vmem:[#allocation2 + $0x1e8] sm:$0xf] %v583_v54  ;;  %v817_v57 = vpop.permute.xlu0 %816  ;;  %2117 = vmatprep.subr.mxu0 %v1850_v63  ;;  %v887_v53 = vsel %vm879_vm15, %v3089_v29, %v878_v41  ;;  %v1851_v44 = vld [vmem:[#allocation2 + $0x320] sm:$0xff]  ;;  %v2241_v15 = vsub.s32 0, %v2240_v11 }
 0x1be   : > { %v826_v37 = vsel %vm4590_vm9, %v3084_v23, %v817_v57  ;;  %2118 = vmatpush1.msra.mxu0 %v1849_v30  ;;  %v1868_v48 = vld [vmem:[#allocation2 + $0x268] sm:$0xff]  ;;  %903 = vst [vmem:[#allocation2 + $0x310] sm:$0xf0] %v887_v53  ;;  %v2249_v54 = vsub.s32 2, %v2240_v11 }
 0x1bf   : > { %842 = vst [vmem:[#allocation2 + $0x310] sm:$0xf] %v826_v37  ;;  %2184 = vmatprep.subr.mxu1 %v1868_v48  ;;  %v2237_v28 = vld [vmem:[#allocation8] sm:$0xff]  ;;  %v2253_v37 = vsub.s32 3, %v2240_v11 }
 0x1c0   : > { %2185 = vmatpush1.msra.mxu1 %v1867_v60  ;;  %v3117_v40 = vpop.permute.xlu1 %3116  ;;  %v2242_v10 = vrot.slane %v2237_v28, %v2241_v15  ;;  %v2250_v53 = vrot.slane %v2237_v28, %v2249_v54 }
 0x1c1   : > { %v3112_v62 = vpop.permute.xlu0 %3111  ;;  %v3119_v43 = vunpack.i.h.bf16 %v3117_v40  ;;  %v3118_v42 = vunpack.i.l.bf16 %v3117_v40 }
 0x1c2   : > { %v3114_v38 = vunpack.i.h.bf16 %v3112_v62  ;;  %v3113_v19 = vunpack.i.l.bf16 %v3112_v62 }
 0x1c3   : > { %v521_v31 = vsel %vm516_vm14, %v4150_v17, %v3118_v42  ;;  %v522_v25 = vsel %vm516_vm14, %v3118_v42, %v3119_v43 }
 0x1c4   : > { %v461_v29 = vsel %vm455_vm3, %v3004_v55, %v3113_v19  ;;  %v462_v35 = vsel %vm455_vm3, %v3113_v19, %v3114_v38  ;;  %v1842_v23 = vld [vmem:[#allocation2 + $0x130] sm:$0xff]  ;;  %537 = vst [vmem:[#allocation2 + $0x1a8] sm:$0xf0] %v521_v31  ;;  %538 = vst [vmem:[#allocation2 + $0x158] sm:$0xf0] %v522_v25  ;;  %v757_v18 = vpop.permute.xlu1 %756  ;;  %v1843_v56 = vld [vmem:[#allocation2 + $0x1e8] sm:$0xff]  ;;  %v2254_v19 = vrot.slane %v2237_v28, %v2253_v37 }
 0x1c5   : > { %477 = vst [vmem:[#allocation2 + $0x158] sm:$0xf] %v461_v29  ;;  %478 = vst [vmem:[#allocation2 + $0x2e0] sm:$0xf] %v462_v35  ;;  %v696_v50 = vpop.permute.xlu0 %695  ;;  %2119 = vmatprep.subr.mxu0 %v1842_v23  ;;  %v766_v17 = vsel %vm758_vm1, %v3099_v39, %v757_v18  ;;  %v1826_v39 = vld [vmem:[#allocation2 + $0x100] sm:$0xff]  ;;  %v2261_v18 = vsub.s32 5, %v2240_v11 }
 0x1c6   : > { %v705_v6 = vsel %vm697_vm0, %v3094_v47, %v696_v50  ;;  %2120 = vmatpush1.msra.mxu0 %v1841_v34  ;;  %v1860_v55 = vld [vmem:[#allocation2 + $0x310] sm:$0xff]  ;;  %782 = vst [vmem:[#allocation2 + $0xf0] sm:$0xf0] %v766_v17  ;;  %v1825_v47 = vld [vmem:[#allocation2 + $0x148] sm:$0xff] }
 0x1c7   : > { %721 = vst [vmem:[#allocation2 + $0xf0] sm:$0xf] %v705_v6  ;;  %2186 = vmatprep.subr.mxu1 %v1860_v55 }
 0x1c8   : > { %2187 = vmatpush1.msra.mxu1 %v1859_v26  ;;  %v636_v14 = vpop.permute.xlu1 %635 }
 0x1c9   : > { %v575_v21 = vpop.permute.xlu0 %574  ;;  %v645_v3 = vsel %vm637_vm13, %v3109_v9, %v636_v14 }
 0x1ca   : > { %v584_v36 = vsel %vm576_vm2, %v3104_v45, %v575_v21  ;;  %661 = vst [vmem:[#allocation2 + $0x38] sm:$0xf0] %v645_v3  ;;  %v2245_v45 = vsub.s32 1, %v2240_v11  ;;  %v2262_v21 = vrot.slane %v2237_v28, %v2261_v18  ;;  %v2265_v3 = vsub.s32 6, %v2240_v11 }
 0x1cb   : > { %600 = vst [vmem:[#allocation2 + $0x38] sm:$0xf] %v584_v36  ;;  %v1833_v61 = vld [vmem:[#allocation2 + $0x1a8] sm:$0xff] }
 0x1cc   : > { %v1834_v32 = vld [vmem:[#allocation2 + $0x158] sm:$0xff]  ;;  %v3122_v8 = vpop.permute.xlu1 %3121  ;;  %v2246_v24 = vrot.slane %v2237_v28, %v2245_v45 }
 0x1cd   : > { %v454_v49 = vpop.permute.xlu0 %453  ;;  %2121 = vmatprep.subr.mxu0 %v1834_v32  ;;  %v3124_v59 = vunpack.i.h.bf16 %v3122_v8  ;;  %v3123_v16 = vunpack.i.l.bf16 %v3122_v8  ;;  %v2269_v8 = vsub.s32 7, %v2240_v11 }
 0x1ce   : > { %v463_v27 = vsel %vm455_vm3, %v3114_v38, %v454_v49  ;;  %2122 = vmatpush1.msra.mxu0 %v1833_v61  ;;  %v1852_v12 = vld [vmem:[#allocation2 + $0xf0] sm:$0xff] }
 0x1cf   : > { %479 = vst [vmem:[#allocation2 + $0x278] sm:$0xf] %v463_v27  ;;  %2123 = vmatprep.subr.mxu0 %v1826_v39  ;;  %2188 = vmatprep.subr.mxu1 %v1852_v12  ;;  %v523_v33 = vsel %vm516_vm14, %v3119_v43, %v3123_v16  ;;  %v524_v20 = vsel %vm516_vm14, %v3123_v16, %v3124_v59  ;;  %v2257_v43 = vsub.s32 4, %v2240_v11 }
 0x1d0   : > { %2124 = vmatpush1.msra.mxu0 %v1825_v47  ;;  %2189 = vmatpush1.msra.mxu1 %v1851_v44  ;;  %539 = vst [vmem:[#allocation2 + $0x2e0] sm:$0xf0] %v523_v33  ;;  %540 = vst [vmem:[#allocation2 + $0x278] sm:$0xf0] %v524_v20  ;;  %v2266_v27 = vrot.slane %v2237_v28, %v2265_v3  ;;  %v2270_v47 = vrot.slane %v2237_v28, %v2269_v8 }
 0x1d1   : > { %2125 = vmatprep.subr.mxu0 %v1818_v2  ;;  %v2258_v23 = vrot.slane %v2237_v28, %v2257_v43 }
 0x1d2   : > { %2126 = vmatpush1.msra.mxu0 %v1817_v46  ;;  %v1844_v5 = vld [vmem:[#allocation2 + $0x38] sm:$0xff] }
 0x1d3   : > { %2498 = vmatmul.mubr.msk.f32.vlgmr.msra.gmra.mxu0 %vm576_vm2, %v4166_v58  ;;  %2190 = vmatprep.subr.mxu1 %v1844_v5 }
 0x1d4   : > { %2191 = vmatpush1.msra.mxu1 %v1843_v56 }
 0x1d7   : > { %v1836_v52 = vld [vmem:[#allocation2 + $0x278] sm:$0xff]  ;;  %v1835_v22 = vld [vmem:[#allocation2 + $0x2e0] sm:$0xff] }
 0x1d8   : > { %2192 = vmatprep.subr.mxu1 %v1836_v52 }
 0x1d9   : > { %2193 = vmatpush1.msra.mxu1 %v1835_v22 }
 0x1da   : > { %2194 = vmatprep.subr.mxu1 %v1828_v4 }
 0x1db   : > { %2195 = vmatpush1.msra.mxu1 %v1827_v1 }
 0x1dc   : > { %2196 = vmatprep.subr.mxu1 %v1820_v0 }
 0x1dd   : > { %2197 = vmatpush1.msra.mxu1 %v1819_v13 }
 0x1de   : > { %2501 = vmatmul.mubr.msk.f32.vlgmr.msra.gmra.mxu1 %vm576_vm2, %v4166_v58 }
 0x239   : > { %v4435_v9 = vpop.f32.mrf.mxu0 }
 0x23a   : > { %v2296_v63 = vmul.f32 %v4435_v9, %v4435_v9  ;;  %v2279_v58 = vmul.f32 %v2242_v10, %v4435_v9 }
 0x23b   : > { %v4437_v7 = vpop.f32.mrf.mxu0 }
 0x23c   : > { %v2297_v41 = vmul.f32 %v4437_v7, %v4437_v7  ;;  %v2280_v30 = vmul.f32 %v2246_v24, %v4437_v7  ;;  %v2304_v48 = vmul.f32 %v2296_v63, %v2242_v10 }
 0x23e   : > { %v2305_v60 = vmul.f32 %v2297_v41, %v2246_v24  ;;  %v2287_v42 = vadd.f32 %v2280_v30, %v2279_v58 }
 0x240   : > { %v2312_v31 = vadd.f32 %v2305_v60, %v2304_v48 }
 0x242   : > { %v4443_v57 = vpop.f32.mrf.mxu1 }
 0x243   : > { %v2298_v40 = vmul.f32 %v4443_v57, %v4443_v57  ;;  %v2281_v38 = vmul.f32 %v2250_v53, %v4443_v57 }
 0x244   : > { %v4449_v62 = vpop.f32.mrf.mxu1 }
 0x245   : > { %v2306_v25 = vmul.f32 %v2298_v40, %v2250_v53  ;;  %v2299_v29 = vmul.f32 %v4449_v62, %v4449_v62  ;;  %v2288_v34 = vadd.f32 %v2287_v42, %v2281_v38  ;;  %v2282_v17 = vmul.f32 %v2254_v19, %v4449_v62 }
 0x247   : > { %v2313_v55 = vadd.f32 %v2312_v31, %v2306_v25  ;;  %v2307_v26 = vmul.f32 %v2299_v29, %v2254_v19  ;;  %v2289_v61 = vadd.f32 %v2288_v34, %v2282_v17 }
 0x249   : > { %v2314_v49 = vadd.f32 %v2313_v55, %v2307_v26 }
 0x293   : > { %v4454_v35 = vpop.f32.mrf.mxu0 }
 0x294   : > { %v2300_v50 = vmul.f32 %v4454_v35, %v4454_v35  ;;  %v2283_v14 = vmul.f32 %v2258_v23, %v4454_v35 }
 0x295   : > { %v2163_v6 = vpop.f32.mrf.mxu0 }
 0x296   : > { %v2308_v36 = vmul.f32 %v2300_v50, %v2258_v23  ;;  %v2301_v32 = vmul.f32 %v2163_v6, %v2163_v6  ;;  %v2290_v59 = vadd.f32 %v2289_v61, %v2283_v14  ;;  %v2284_v16 = vmul.f32 %v2262_v21, %v2163_v6 }
 0x298   : > { %v2315_v39 = vadd.f32 %v2314_v49, %v2308_v36  ;;  %v2309_v12 = vmul.f32 %v2301_v32, %v2262_v21  ;;  %v2291_v33 = vadd.f32 %v2290_v59, %v2284_v16 }
 0x29a   : > { %v2316_v46 = vadd.f32 %v2315_v39, %v2309_v12 }
 0x29e   : > { %v2232_v44 = vpop.f32.mrf.mxu1 }
 0x29f   : > { %v2285_v20 = vmul.f32 %v2266_v27, %v2232_v44  ;;  %v2302_v2 = vmul.f32 %v2232_v44, %v2232_v44 }
 0x2a0   : > { %v2234_v5 = vpop.f32.mrf.mxu1 }
 0x2a1   : > { %v2292_v56 = vadd.f32 %v2291_v33, %v2285_v20  ;;  %v2310_v52 = vmul.f32 %v2302_v2, %v2266_v27  ;;  %v2286_v22 = vmul.f32 %v2270_v47, %v2234_v5  ;;  %v2303_v4 = vmul.f32 %v2234_v5, %v2234_v5 }
 0x2a3   : > { %v2293_v1 = vadd.f32 %v2292_v56, %v2286_v22  ;;  %v2311_v0 = vmul.f32 %v2303_v4, %v2270_v47  ;;  %v2317_v13 = vadd.f32 %v2316_v46, %v2310_v52 }
 0x2a5   : > { %2294 = vadd.xlane.f32.xlu0 %v2293_v1  ;;  %v2318_v51 = vadd.f32 %v2317_v13, %v2311_v0 }
 0x2a7   : > { %2319 = vadd.xlane.f32.xlu1 %v2318_v51 }
 0x32e   : > { %v2295_v11 = vpop.xlane.xlu0 %2294 }
 0x32f   : > { %v2321_v15 = vmul.f32 0.001953125, %v2295_v11 }
 0x330   : > { %v2320_v45 = vpop.xlane.xlu1 %2319 }
 0x331   : > { %v2322_v28 = vmul.f32 0.001953125, %v2320_v45  ;;  %v2323_v10 = vmul.f32 %v2321_v15, %v2321_v15  ;;  %v2326_v41 = vsub.f32 %v4435_v9, %v2321_v15  ;;  %v2327_v58 = vsub.f32 %v4437_v7, %v2321_v15 }
 0x332   : > { %v2328_v30 = vsub.f32 %v4443_v57, %v2321_v15  ;;  %v2329_v53 = vsub.f32 %v4449_v62, %v2321_v15  ;;  %v2330_v48 = vsub.f32 %v4454_v35, %v2321_v15  ;;  %v2331_v60 = vsub.f32 %v2163_v6, %v2321_v15 }
 0x333   : > { %v2324_v24 = vsub.f32 %v2322_v28, %v2323_v10  ;;  %v2332_v40 = vsub.f32 %v2232_v44, %v2321_v15  ;;  %v2333_v43 = vsub.f32 %v2234_v5, %v2321_v15 }
 0x335   : > { %v2325_v54 = vmax.f32 %v2324_v24, 0.0 }
 0x337   : > { %v2334_v63 = vadd.f32 1e-05, %v2325_v54 }
 0x339   : > { %3125 = vrsqrt.f32 %v2334_v63 }
 0x346   : > { %v3126_v37 = vpop.eup %3125 }
 0x347   : > { %v2336_v42 = vmul.f32 %v3126_v37, %v2326_v41  ;;  %v2337_v38 = vmul.f32 %v3126_v37, %v2327_v58  ;;  %v2338_v19 = vmul.f32 %v3126_v37, %v2328_v30  ;;  %v2339_v31 = vmul.f32 %v3126_v37, %v2329_v53 }
 0x348   : > { %v2340_v25 = vmul.f32 %v3126_v37, %v2330_v48  ;;  %v2341_v29 = vmul.f32 %v3126_v37, %v2331_v60  ;;  %v2342_v9 = vmul.f32 %v3126_v37, %v2332_v40  ;;  %v2343_v23 = vmul.f32 %v3126_v37, %v2333_v43 }
 0x349   : > { %vm2344_vm3 = vcmp.ge.f32.partialorder %v2336_v42, 0.0  ;;  %vm2345_vm13 = vcmp.ge.f32.partialorder %v2337_v38, 0.0  ;;  %vm2346_vm14 = vcmp.ge.f32.partialorder %v2338_v19, 0.0  ;;  %vm2347_vm15 = vcmp.ge.f32.partialorder %v2339_v31, 0.0 }
 0x34a   : > { %vm2348_vm0 = vcmp.ge.f32.partialorder %v2340_v25, 0.0  ;;  %vm2349_vm1 = vcmp.ge.f32.partialorder %v2341_v29, 0.0  ;;  %vm2350_vm2 = vcmp.ge.f32.partialorder %v2342_v9, 0.0  ;;  %vm2351_vm10 = vcmp.ge.f32.partialorder %v2343_v23, 0.0 }
 0x34b   : > { %v2352_v7 = vmul.f32 0.01, %v2336_v42  ;;  %v2353_v57 = vmul.f32 0.01, %v2337_v38  ;;  %v2354_v62 = vmul.f32 0.01, %v2338_v19 }
 0x34c   : > { %v2355_v35 = vmul.f32 0.01, %v2339_v31  ;;  %v2356_v18 = vmul.f32 0.01, %v2340_v25  ;;  %v2357_v50 = vmul.f32 0.01, %v2341_v29 }
 0x34d   : > { %v2358_v34 = vmul.f32 0.01, %v2342_v9  ;;  %v2359_v17 = vmul.f32 0.01, %v2343_v23  ;;  %v2360_v6 = vsel %vm2344_vm3, %v2336_v42, %v2352_v7  ;;  %v2361_v55 = vsel %vm2345_vm13, %v2337_v38, %v2353_v57 }
 0x34e   : > { %v2362_v26 = vsel %vm2346_vm14, %v2338_v19, %v2354_v62  ;;  %v2363_v14 = vsel %vm2347_vm15, %v2339_v31, %v2355_v35  ;;  %v2364_v21 = vsel %vm2348_vm0, %v2340_v25, %v2356_v18  ;;  %v2365_v3 = vsel %vm2349_vm1, %v2341_v29, %v2357_v50  ;;  %2368 = vst [vmem:[%s211_s10] sm:$0xff] %v2360_v6 }
 0x34f   : > { %2369 = vst [vmem:[%s211_s10 + $0x8] sm:$0xff] %v2361_v55  ;;  %v2366_v36 = vsel %vm2350_vm2, %v2342_v9, %v2358_v34  ;;  %v2367_v32 = vsel %vm2351_vm10, %v2343_v23, %v2359_v17  ;;  %2370 = vst [vmem:[%s211_s10 + $0x10] sm:$0xff] %v2362_v26 }
 0x350   : > { %2371 = vst [vmem:[%s211_s10 + $0x18] sm:$0xff] %v2363_v14  ;;  %2372 = vst [vmem:[%s211_s10 + $0x20] sm:$0xff] %v2364_v21 }
 0x351   : > { %2373 = vst [vmem:[%s211_s10 + $0x28] sm:$0xff] %v2365_v3  ;;  %2374 = vst [vmem:[%s211_s10 + $0x30] sm:$0xff] %v2366_v36 }
 0x352   : > { %2375 = vst [vmem:[%s211_s10 + $0x38] sm:$0xff] %v2367_v32 }
 0x353   : > { %3220 = shalt.err (!%p3217_p12)
}
 0x354   : > { %s3221_s28 = scalar_lea.hbm %s4476_s25, 1024  ;;  %s3225_s5 = scalar_lea.hbm %s4524_s3, 2048 }
 0x355   : > { %p3222_p11 = scmp.ne.s32.totalorder %s4476_s25, %s3221_s28  ;;  %p3226_p5 = scmp.lt.s32.totalorder %s4476_s25, %s4524_s3 }
 0x356   : > { %p3227_p9 = scmp.lt.s32.totalorder %s3225_s5, %s3221_s28 }
 0x357   : > { %p3223_p7 = pnand %p3222_p11, %p4591_p0 }
 0x358   : > { %p3228_p3 = por %p3227_p9, %p3226_p5 }
 0x359   : > { %p3224_p10 = pneg %p3223_p7 }
 0x35b   : > { %p3229_p13 = pnand %p3228_p3, %p3224_p10 }
 0x35d   : > { %3232 = shalt.err (!%p3229_p13)
}
 0x35e   : > { %2521 = dma.vmem_to_hbm [thread:$0]  (%p4591_p0), %s4478_s17, 1024, %s4476_s25, %s2377_s29  }
 0x35f PF: > { %s2403_s11 = sand.u32 1, %s3263_s12   ;;  %p4592_p1 = scmp.ne.s32.totalorder %s4552_s19, 0 }
 0x360   : > { %p4593_p2 = scmp.ge.s32.totalorder %s3275_s15, 2  ;;  %s2404_s30 = scalar_lea.sflag [#allocation5], %s2403_s11 }
 0x362   : > { %p2535_p4 = pnand %p4593_p2, %p4592_p1 }
 0x364   : > { %p2536_p6 = pneg %p2535_p4 }
 0x366   : > { %3258 = dma.done.wait (%p2536_p6), %s2404_s30, 1024  }
 0x367   : > { %3260 = vsyncadd (%p2536_p6), %s2404_s30, 4294966272  ;;  %p17_p8 = scmp.ge.s32.totalorder %s3382_s26, 4   ;;  %s4594_s12 = smov %s3267_s13 }
 0x368   : > { %s4595_s13 = smov %s3271_s14  ;;  %s4596_s14 = smov %s3409_s8 }
 0x369   : > { %s4597_s15 = smov %s3382_s26  ;;  %19 = sbr.rel (!%p17_p8) target bundleno = 6 (0x6), region = 85 }
 0x36e   :  { %2409 = vsyncpa [#allocation4], 1 }
 0x36f   :  { %2411 = vsyncpa [#allocation4 + $0x1], 1 }
 0x370   :  { %2412 = vsyncpa [#allocation7], 1 }
 0x371   :  { %2413 = vsyncpa [#allocation5], 1 }
 0x372   :  { %2415 = vsyncpa [#allocation5 + $0x1], 1 }

</bundles_post_ra>
